<compile_context>
chip_gen: v7x
topology: tpu7x:2x2x1
jax: 0.10.0
libtpu: 0.0.40
codegen_flags: <defaults>
</compile_context>

<pallas_src>
import functools
import math

import jax
import jax.numpy as jnp
import numpy as np
from jax.experimental import pallas as pl
from jax.experimental.pallas import tpu as pltpu


# ----------------------------------------------------------------------------
# Pallas kernel: batched per-bucket attention (BG buckets per grid step)
# ----------------------------------------------------------------------------
def _smyrf_bucket_kernel(*refs, softmax_temp, has_mask):
    if has_mask:
        q_ref, k_ref, v_ref, mask_ref, o_ref, lse_ref = refs
    else:
        q_ref, k_ref, v_ref, o_ref, lse_ref = refs
        mask_ref = None

    q = q_ref[...]          # (BG, qc, E) bf16
    k = k_ref[...]          # (BG, kc, E) bf16
    v = v_ref[...]          # (BG, kc, D) bf16

    # inner = q @ k^T * softmax_temp   (batched MXU matmul, f32 accumulation)
    inner = jnp.einsum('gqe,gke->gqk', q, k,
                       preferred_element_type=jnp.float32) * softmax_temp

    neg = -jnp.finfo(jnp.float32).max
    if has_mask:
        # mask_ref: (BG, 1, kc), 1.0 = valid key, 0.0 = padded/masked key
        inner = jnp.where(mask_ref[...] > 0.5, inner, neg)

    # numerically-stable softmax with a single exp pass
    m = jnp.max(inner, axis=-1, keepdims=True)          # (BG, qc, 1)
    e = jnp.exp(inner - m)                              # (BG, qc, kc)
    s = jnp.sum(e, axis=-1, keepdims=True)              # (BG, qc, 1)
    lse = m + jnp.log(s)                                # (BG, qc, 1)
    dots = e * pl.reciprocal(s, approx=True)            # (BG, qc, kc)
    if has_mask:
        # rows whose keys are all masked -> zero output (matches masked_fill(0))
        dots = jnp.where(m <= neg, 0.0, dots)

    so = jnp.einsum('gqk,gkd->gqd', dots.astype(v.dtype), v,
                    preferred_element_type=jnp.float32)
    o_ref[...] = so.astype(o_ref.dtype)
    lse_ref[...] = lse.astype(lse_ref.dtype)


def smyrf_bucket_attention(s_q, s_k, s_v, s_mask, softmax_temp, *,
                           bucket_group=64):
    """s_q:(G,qc,E) s_k:(G,kc,E) s_v:(G,kc,D) s_mask:(G,1,kc) or None."""
    G, qc, E = s_q.shape
    kc = s_k.shape[1]
    D = s_v.shape[2]
    has_mask = s_mask is not None

    # group BG buckets per grid step; pad G so the grid length is a nice even
    # number (keeps both v7x TensorCores busy, no-op on v5e/v6e).
    BG = max(1, min(int(bucket_group), G))
    num_groups = -(-G // BG)
    if num_groups > 1 and num_groups % 2 == 1:
        num_groups += 1
    Gp = num_groups * BG
    if Gp != G:
        pad = Gp - G
        s_q = jnp.pad(s_q, ((0, pad), (0, 0), (0, 0)))
        s_k = jnp.pad(s_k, ((0, pad), (0, 0), (0, 0)))
        s_v = jnp.pad(s_v, ((0, pad), (0, 0), (0, 0)))
        if has_mask:
            s_mask = jnp.pad(s_mask, ((0, pad), (0, 0), (0, 0)))

    kernel = functools.partial(_smyrf_bucket_kernel,
                               softmax_temp=float(softmax_temp),
                               has_mask=has_mask)

    in_specs = [pl.BlockSpec((BG, qc, E), lambda g: (g, 0, 0)),
                pl.BlockSpec((BG, kc, E), lambda g: (g, 0, 0)),
                pl.BlockSpec((BG, kc, D), lambda g: (g, 0, 0))]
    inputs = [s_q, s_k, s_v]
    if has_mask:
        in_specs.append(pl.BlockSpec((BG, 1, kc), lambda g: (g, 0, 0)))
        inputs.append(s_mask)

    so, lse = pl.pallas_call(
        kernel,
        out_shape=(jax.ShapeDtypeStruct((Gp, qc, D), jnp.bfloat16),
                   jax.ShapeDtypeStruct((Gp, qc, 1), jnp.float32)),
        grid=(num_groups,),
        in_specs=in_specs,
        out_specs=(pl.BlockSpec((BG, qc, D), lambda g: (g, 0, 0)),
                   pl.BlockSpec((BG, qc, 1), lambda g: (g, 0, 0))),
        compiler_params=pltpu.CompilerParams(
            dimension_semantics=("parallel",),
            vmem_limit_bytes=64 * 1024 * 1024),
    )(*inputs)

    if Gp != G:
        so = so[:G]
        lse = lse[:G]
    return so, lse


def _reference_bucket_attention(s_q, s_k, s_v, s_mask, softmax_temp):
    """Pure-JAX reference of the kernel (for the correctness check)."""
    q = s_q.astype(jnp.float32)
    k = s_k.astype(jnp.float32)
    v = s_v.astype(jnp.float32)
    inner = jnp.einsum('gie,gje->gij', q, k) * softmax_temp
    neg = -jnp.finfo(jnp.float32).max
    if s_mask is not None:
        inner = jnp.where(s_mask > 0.5, inner, neg)
    lse = jax.nn.logsumexp(inner, axis=-1, keepdims=True)
    dots = jnp.exp(inner - lse)
    if s_mask is not None:
        full_row = jnp.max(inner, axis=-1, keepdims=True) <= neg
        dots = jnp.where(full_row, 0.0, dots)
    so = jnp.einsum('gij,gjd->gid', dots, v)
    return so, lse


# ----------------------------------------------------------------------------
# Glue: padding, XBOX+ asymmetric transform, E2LSH clustering, (un)sorting
# ----------------------------------------------------------------------------
def pad_to_multiple(x, multiple, axis):
    length = x.shape[axis]
    pad = (-length) % multiple
    if pad == 0:
        return x
    pad_width = [(0, 0)] * x.ndim
    pad_width[axis] = (0, pad)
    return jnp.pad(x, pad_width)


def xbox_plus(q, k):
    """XBOX+ asymmetric transform.  q,k: (bs, seq, E)."""
    q_norm = jnp.linalg.norm(q, axis=-1, keepdims=True)
    k_norm = jnp.linalg.norm(k, axis=-1, keepdims=True)
    mq = jnp.max(q_norm, axis=1, keepdims=True)
    mk = jnp.max(k_norm, axis=1, keepdims=True)
    ext_q = jnp.sqrt(jnp.maximum(mq ** 2 + mk ** 2 - q_norm ** 2, 0.0))
    ext_k = jnp.sqrt(jnp.maximum(mq ** 2 + mk ** 2 - k_norm ** 2, 0.0))
    q_t = jnp.concatenate([q, ext_q, jnp.zeros_like(ext_q)], axis=-1)
    k_t = jnp.concatenate([k, jnp.zeros_like(ext_k), ext_k], axis=-1)
    return q_t, k_t


def lsh_clustering(rng, q_t, k_t, n_hashes, r, key_padding_mask=None):
    """E2LSH random-projection clustering; returns per-hash sort permutations."""
    dim = q_t.shape[-1]
    k_alpha, k_beta = jax.random.split(rng)
    alpha = jax.random.normal(k_alpha, (dim, n_hashes), dtype=q_t.dtype)
    beta = jax.random.uniform(k_beta, (1, n_hashes), minval=0.0,
                              maxval=float(r), dtype=q_t.dtype)
    q_hash = jnp.transpose(q_t @ alpha + beta, (2, 0, 1))   # (nh, bs, T)
    k_hash = jnp.transpose(k_t @ alpha + beta, (2, 0, 1))   # (nh, bs, S)
    if key_padding_mask is not None:
        # padded/masked keys get +inf hash -> they sort into trailing positions
        k_hash = jnp.where(key_padding_mask, k_hash, jnp.inf)
    return jnp.argsort(q_hash, axis=-1), jnp.argsort(k_hash, axis=-1)


def sort_to_buckets(x, perm, bucketsz):
    """x: (bs, s, d), perm: (nh, bs, s) -> (nh, bs, nbuckets, bucketsz, d)."""
    gathered = jnp.take_along_axis(x[None], perm[..., None], axis=2)
    nh, bs, s, d = gathered.shape
    return gathered.reshape(nh, bs, s // bucketsz, bucketsz, d)


def unsort_from_buckets(s_x, perm_inv):
    nh, bs, nb, bz, d = s_x.shape
    b_x = s_x.reshape(nh, bs, nb * bz, d)
    return jnp.take_along_axis(b_x, perm_inv[..., None], axis=2)


# ----------------------------------------------------------------------------
# Full SmyrfAttention forward
# ----------------------------------------------------------------------------
def smyrf_attention(query, key, value, *, n_hashes, q_cluster_size,
                    k_cluster_size, r=1.0, softmax_temp=None, hash_rng,
                    key_padding_mask=None, use_pallas=True, bucket_group=64):
    """query:(B,T,H,E)  key:(B,S,H,E)  value:(B,S,H,D)  ->  out:(B,T,H,D)."""
    B, q_seqlen_og, H, E = query.shape
    _, k_seqlen_og, _, D = value.shape

    query = pad_to_multiple(query, q_cluster_size, axis=1)
    key = pad_to_multiple(key, k_cluster_size, axis=1)
    value = pad_to_multiple(value, k_cluster_size, axis=1)
    T = query.shape[1]
    S = key.shape[1]
    assert T // q_cluster_size == S // k_cluster_size, \
        "Unequal number of clusters for query and key."

    if softmax_temp is None:
        softmax_temp = 1.0 / math.sqrt(E)

    # trace-time decision (no device round-trip): mask active iff the key seq
    # was padded or a user mask was supplied.
    need_mask = (S > k_seqlen_og) or (key_padding_mask is not None)
    if need_mask:
        if key_padding_mask is None:
            key_padding_mask = jnp.broadcast_to(
                jnp.arange(S)[None, :] < k_seqlen_og, (B, S))
        elif key_padding_mask.shape[1] < S:
            key_padding_mask = jnp.pad(
                key_padding_mask,
                ((0, 0), (0, S - key_padding_mask.shape[1])),
                constant_values=False)

    # 'b t h e -> (b h) t e'
    q = query.transpose(0, 2, 1, 3).reshape(B * H, T, E).astype(jnp.float32)
    k = key.transpose(0, 2, 1, 3).reshape(B * H, S, E).astype(jnp.float32)
    v = value.transpose(0, 2, 1, 3).reshape(B * H, S, D).astype(jnp.float32)
    bs = B * H

    kpm_bool = jnp.repeat(key_padding_mask, H, axis=0) if need_mask else None

    # --- LSH clustering (no_grad section of the reference), in f32 ---
    q_t, k_t = xbox_plus(q, k)
    q_pos, k_pos = lsh_clustering(
        hash_rng, q_t, k_t, n_hashes, r,
        key_padding_mask=kpm_bool[None] if need_mask else None)

    # bucket-sorted data travels in bf16 (halves glue + kernel HBM traffic)
    qb = q.astype(jnp.bfloat16)
    kb = k.astype(jnp.bfloat16)
    vb = v.astype(jnp.bfloat16)
    s_query = sort_to_buckets(qb, q_pos, q_cluster_size)   # (nh,bs,nb,qc,E)
    s_key = sort_to_buckets(kb, k_pos, k_cluster_size)     # (nh,bs,nb,kc,E)
    s_value = sort_to_buckets(vb, k_pos, k_cluster_size)   # (nh,bs,nb,kc,D)

    nh, _, nb = s_query.shape[:3]
    G = nh * bs * nb

    if need_mask:
        s_kpm = sort_to_buckets(kpm_bool[..., None].astype(jnp.float32),
                                k_pos, k_cluster_size)      # (nh,bs,nb,kc,1)
        s_kpm = jnp.swapaxes(s_kpm, -1, -2)                 # (nh,bs,nb,1,kc)
        s_mask = s_kpm.reshape(G, 1, k_cluster_size)
    else:
        s_mask = None

    s_q_flat = s_query.reshape(G, q_cluster_size, E)
    s_k_flat = s_key.reshape(G, k_cluster_size, E)
    s_v_flat = s_value.reshape(G, k_cluster_size, D)

    if use_pallas:
        so, lse = smyrf_bucket_attention(s_q_flat, s_k_flat, s_v_flat, s_mask,
                                         softmax_temp,
                                         bucket_group=bucket_group)
    else:
        so, lse = _reference_bucket_attention(s_q_flat, s_k_flat, s_v_flat,
                                              s_mask, softmax_temp)

    so = so.astype(jnp.float32).reshape(nh, bs, nb, q_cluster_size, D)
    lse = lse.reshape(nh, bs, nb, q_cluster_size, 1)

    # unsort and combine hash rounds with a softmax over the hash dimension
    q_rev_pos = jnp.argsort(q_pos, axis=-1)                 # inverse permutation
    o = unsort_from_buckets(so, q_rev_pos)                  # (nh, bs, T, D)
    logits = unsort_from_buckets(lse, q_rev_pos)            # (nh, bs, T, 1)
    probs = jnp.exp(logits - jax.nn.logsumexp(logits, axis=0, keepdims=True))
    out = jnp.sum(o * probs, axis=0)                        # (bs, T, D)

    out = out.reshape(B, H, T, D).transpose(0, 2, 1, 3)     # '(b h) t d -> b t h d'
    return out[:, :q_seqlen_og]


# ----------------------------------------------------------------------------
if __name__ == "__main__":
    # small deterministic example (module hyper-params chosen accordingly)
    B, SEQ, H, E = 2, 12, 2, 32          # seq=12 pads to 16 -> exercises masking
    n_hashes, qc, kc = 2, 8, 8

    root = jax.random.PRNGKey(0)
    kq, kk, kv, khash = jax.random.split(root, 4)
    query = jax.random.normal(kq, (B, SEQ, H, E), dtype=jnp.float32)
    key = jax.random.normal(kk, (B, SEQ, H, E), dtype=jnp.float32)
    value = jax.random.normal(kv, (B, SEQ, H, E), dtype=jnp.float32)

    # 1) grouped Pallas kernel (masked path, one bucket-group per step)
    out = smyrf_attention(query, key, value, n_hashes=n_hashes,
                          q_cluster_size=qc, k_cluster_size=kc, r=1.0,
                          hash_rng=khash, use_pallas=True)
    jax.block_until_ready(out)

    out_ref = smyrf_attention(query, key, value, n_hashes=n_hashes,
                              q_cluster_size=qc, k_cluster_size=kc, r=1.0,
                              hash_rng=khash, use_pallas=False)
    np.testing.assert_allclose(np.asarray(out), np.asarray(out_ref),
                               rtol=2e-2, atol=2e-2)

    # 2) exercise the group-padding / even-grid path
    out_pad = smyrf_attention(query, key, value, n_hashes=n_hashes,
                              q_cluster_size=qc, k_cluster_size=kc, r=1.0,
                              hash_rng=khash, use_pallas=True, bucket_group=6)
    jax.block_until_ready(out_pad)
    np.testing.assert_allclose(np.asarray(out_pad), np.asarray(out_ref),
                               rtol=2e-2, atol=2e-2)

    # 3) exercise the no-mask specialization (seq already a cluster multiple)
    query2 = jax.random.normal(kq, (B, 16, H, E), dtype=jnp.float32)
    key2 = jax.random.normal(kk, (B, 16, H, E), dtype=jnp.float32)
    value2 = jax.random.normal(kv, (B, 16, H, E), dtype=jnp.float32)
    out2 = smyrf_attention(query2, key2, value2, n_hashes=n_hashes,
                           q_cluster_size=qc, k_cluster_size=kc, r=1.0,
                           hash_rng=khash, use_pallas=True)
    jax.block_until_ready(out2)
    out2_ref = smyrf_attention(query2, key2, value2, n_hashes=n_hashes,
                               q_cluster_size=qc, k_cluster_size=kc, r=1.0,
                               hash_rng=khash, use_pallas=False)
    np.testing.assert_allclose(np.asarray(out2), np.asarray(out2_ref),
                               rtol=2e-2, atol=2e-2)

    assert out.shape == (B, SEQ, H, E)
    print("KERNEL_OK")
</pallas_src>

<mosaic_0001>
module attributes {stable_mosaic.version = 11 : i64} {
  func.func @_smyrf_bucket_kernel(%arg0: i32, %arg1: memref<16x8x32xbf16, #tpu.memory_space<vmem>>, %arg2: memref<16x8x32xbf16, #tpu.memory_space<vmem>>, %arg3: memref<16x8x32xbf16, #tpu.memory_space<vmem>>, %arg4: memref<16x1x8xf32, #tpu.memory_space<vmem>>, %arg5: memref<16x8x32xbf16, #tpu.memory_space<vmem>>, %arg6: memref<16x8x1xf32, #tpu.memory_space<vmem>>) attributes {dimension_semantics = [#tpu.dimension_semantics<parallel>], iteration_bounds = array<i64: 1>, scalar_prefetch = 0 : i64, scratch_operands = 0 : i64, tpu.core_type = #tpu.core_type<tc>, window_params = [{transform_indices = @transform_0, window_bounds = array<i64: 16, 8, 32>}, {transform_indices = @transform_1, window_bounds = array<i64: 16, 8, 32>}, {transform_indices = @transform_2, window_bounds = array<i64: 16, 8, 32>}, {transform_indices = @transform_3, window_bounds = array<i64: 16, 1, 8>}, {transform_indices = @transform_4, window_bounds = array<i64: 16, 8, 32>}, {transform_indices = @transform_5, window_bounds = array<i64: 16, 8, 1>}]} {
    %c0 = arith.constant 0 : index
    %c0_0 = arith.constant 0 : index
    %c0_1 = arith.constant 0 : index
    %0 = vector.load %arg1[%c0, %c0_0, %c0_1] : memref<16x8x32xbf16, #tpu.memory_space<vmem>>, vector<16x8x32xbf16>
    %c0_2 = arith.constant 0 : index
    %c0_3 = arith.constant 0 : index
    %c0_4 = arith.constant 0 : index
    %1 = vector.load %arg2[%c0_2, %c0_3, %c0_4] : memref<16x8x32xbf16, #tpu.memory_space<vmem>>, vector<16x8x32xbf16>
    %c0_5 = arith.constant 0 : index
    %c0_6 = arith.constant 0 : index
    %c0_7 = arith.constant 0 : index
    %2 = vector.load %arg3[%c0_5, %c0_6, %c0_7] : memref<16x8x32xbf16, #tpu.memory_space<vmem>>, vector<16x8x32xbf16>
    "tpu.trace_start"() <{level = 10 : i32, message = "gqe,gke->gqk"}> : () -> ()
    %cst = arith.constant dense<0.000000e+00> : vector<16x8x8xf32>
    %3 = tpu.matmul %0, %1, %cst {dimension_numbers = #tpu.dot_dimension_numbers<[2], [2], [1], [1], [0, 0, 0, 1, 1, 1], [0], [0]>} : vector<16x8x32xbf16>, vector<16x8x32xbf16>, vector<16x8x8xf32> -> vector<16x8x8xf32>
    "tpu.trace_stop"() : () -> ()
    %cst_8 = arith.constant 0.176776692 : f32
    %4 = vector.broadcast %cst_8 : f32 to vector<16x8x8xf32>
    %5 = arith.mulf %3, %4 : vector<16x8x8xf32>
    %c0_9 = arith.constant 0 : index
    %c0_10 = arith.constant 0 : index
    %c0_11 = arith.constant 0 : index
    %6 = vector.load %arg4[%c0_9, %c0_10, %c0_11] : memref<16x1x8xf32, #tpu.memory_space<vmem>>, vector<16x1x8xf32>
    %cst_12 = arith.constant 5.000000e-01 : f32
    %7 = vector.broadcast %cst_12 : f32 to vector<16x1x8xf32>
    %8 = arith.cmpf ogt, %6, %7 : vector<16x1x8xf32>
    %cst_13 = arith.constant -3.40282347E+38 : f32
    %9 = vector.shape_cast %8 : vector<16x1x8xi1> to vector<16x1x8xi1>
    %10 = vector.broadcast %9 : vector<16x1x8xi1> to vector<16x8x8xi1>
    %11 = vector.broadcast %cst_13 : f32 to vector<16x8x8xf32>
    %12 = arith.select %10, %5, %11 : vector<16x8x8xi1>, vector<16x8x8xf32>
    %cst_14 = arith.constant dense<0xFF800000> : vector<16x8xf32>
    %13 = vector.multi_reduction <maximumf>, %12, %cst_14 [2] : vector<16x8x8xf32> to vector<16x8xf32>
    %14 = vector.shape_cast %13 : vector<16x8xf32> to vector<16x8x1xf32>
    %15 = vector.broadcast %14 : vector<16x8x1xf32> to vector<16x8x8xf32>
    %16 = arith.subf %12, %15 : vector<16x8x8xf32>
    %17 = math.exp %16 : vector<16x8x8xf32>
    %cst_15 = arith.constant dense<0.000000e+00> : vector<16x8xf32>
    %18 = vector.multi_reduction <add>, %17, %cst_15 [2] : vector<16x8x8xf32> to vector<16x8xf32>
    %19 = vector.shape_cast %18 : vector<16x8xf32> to vector<16x8x1xf32>
    %20 = math.log %19 : vector<16x8x1xf32>
    %21 = arith.addf %14, %20 : vector<16x8x1xf32>
    %22 = tpu.reciprocal %19 {approx = true} : vector<16x8x1xf32> -> vector<16x8x1xf32>
    %23 = vector.broadcast %22 : vector<16x8x1xf32> to vector<16x8x8xf32>
    %24 = arith.mulf %17, %23 : vector<16x8x8xf32>
    %cst_16 = arith.constant -3.40282347E+38 : f32
    %25 = vector.broadcast %cst_16 : f32 to vector<16x8x1xf32>
    %26 = arith.cmpf ole, %14, %25 : vector<16x8x1xf32>
    %cst_17 = arith.constant 0.000000e+00 : f32
    %27 = vector.shape_cast %26 : vector<16x8x1xi1> to vector<16x8x1xi1>
    %28 = vector.broadcast %27 : vector<16x8x1xi1> to vector<16x8x8xi1>
    %29 = vector.broadcast %cst_17 : f32 to vector<16x8x8xf32>
    %30 = arith.select %28, %29, %24 : vector<16x8x8xi1>, vector<16x8x8xf32>
    %31 = arith.truncf %30 : vector<16x8x8xf32> to vector<16x8x8xbf16>
    "tpu.trace_start"() <{level = 10 : i32, message = "gqk,gkd->gqd"}> : () -> ()
    %cst_18 = arith.constant dense<0.000000e+00> : vector<16x8x32xf32>
    %32 = tpu.matmul %31, %2, %cst_18 {dimension_numbers = #tpu.dot_dimension_numbers<[2], [1], [1], [2], [0, 0, 0, 1, 1, 2], [0], [0]>} : vector<16x8x8xbf16>, vector<16x8x32xbf16>, vector<16x8x32xf32> -> vector<16x8x32xf32>
    "tpu.trace_stop"() : () -> ()
    %33 = arith.truncf %32 : vector<16x8x32xf32> to vector<16x8x32xbf16>
    %c0_19 = arith.constant 0 : index
    %c0_20 = arith.constant 0 : index
    %c0_21 = arith.constant 0 : index
    %34 = vector.load %arg5[%c0_19, %c0_20, %c0_21] : memref<16x8x32xbf16, #tpu.memory_space<vmem>>, vector<16x8x32xbf16>
    tpu.vector_store %arg5[%c0_19, %c0_20, %c0_21], %33 {strides = array<i32>} : memref<16x8x32xbf16, #tpu.memory_space<vmem>>, vector<16x8x32xbf16>,
    %c0_22 = arith.constant 0 : index
    %c0_23 = arith.constant 0 : index
    %c0_24 = arith.constant 0 : index
    %35 = vector.load %arg6[%c0_22, %c0_23, %c0_24] : memref<16x8x1xf32, #tpu.memory_space<vmem>>, vector<16x8x1xf32>
    tpu.vector_store %arg6[%c0_22, %c0_23, %c0_24], %21 {strides = array<i32>} : memref<16x8x1xf32, #tpu.memory_space<vmem>>, vector<16x8x1xf32>,
    return
  }
  func.func @transform_0(%arg0: i32) -> (i32, i32, i32) {
    %c0_i32 = arith.constant 0 : i32
    %c0_i32_0 = arith.constant 0 : i32
    %c0_i32_1 = arith.constant 0 : i32
    return %arg0, %c0_i32, %c0_i32_0 : i32, i32, i32
  }
  func.func @transform_1(%arg0: i32) -> (i32, i32, i32) {
    %c0_i32 = arith.constant 0 : i32
    %c0_i32_0 = arith.constant 0 : i32
    %c0_i32_1 = arith.constant 0 : i32
    return %arg0, %c0_i32, %c0_i32_0 : i32, i32, i32
  }
  func.func @transform_2(%arg0: i32) -> (i32, i32, i32) {
    %c0_i32 = arith.constant 0 : i32
    %c0_i32_0 = arith.constant 0 : i32
    %c0_i32_1 = arith.constant 0 : i32
    return %arg0, %c0_i32, %c0_i32_0 : i32, i32, i32
  }
  func.func @transform_3(%arg0: i32) -> (i32, i32, i32) {
    %c0_i32 = arith.constant 0 : i32
    %c0_i32_0 = arith.constant 0 : i32
    %c0_i32_1 = arith.constant 0 : i32
    return %arg0, %c0_i32, %c0_i32_0 : i32, i32, i32
  }
  func.func @transform_4(%arg0: i32) -> (i32, i32, i32) {
    %c0_i32 = arith.constant 0 : i32
    %c0_i32_0 = arith.constant 0 : i32
    %c0_i32_1 = arith.constant 0 : i32
    return %arg0, %c0_i32, %c0_i32_0 : i32, i32, i32
  }
  func.func @transform_5(%arg0: i32) -> (i32, i32, i32) {
    %c0_i32 = arith.constant 0 : i32
    %c0_i32_0 = arith.constant 0 : i32
    %c0_i32_1 = arith.constant 0 : i32
    return %arg0, %c0_i32, %c0_i32_0 : i32, i32, i32
  }
}

</mosaic_0001>

<bundles_post_ra>
// kernel: tpu_custom_call.1
= control target key start
LH: loop header
LB: loop body
LE: loop exit
PB: predicated region body
PF: predicated region fallthrough
CT: control target
= control target key end

     0   :  { %11 = vsyncpa [#allocation3], 0  ;;  %s3305_s0 = inlined_call_operand.hbm [shape: bf16[16,8,32], index: 0, kind: input, shape index: {}]   ;;  %s3306_s1 = inlined_call_operand.hbm [shape: bf16[16,8,32], index: 1, kind: input, shape index: {}]   ;;  %s3307_s2 = inlined_call_operand.hbm [shape: bf16[16,8,32], index: 2, kind: input, shape index: {}]   ;;  %s3308_s3 = inlined_call_operand.hbm [shape: f32[16,1,8], index: 3, kind: input, shape index: {}]   ;;  %s3309_s4 = inlined_call_operand.hbm [shape: bf16[16,8,32], index: 4, kind: output, shape index: {0}]   ;;  %s3310_s5 = inlined_call_operand.hbm [shape: f32[16,8,1], index: 5, kind: output, shape index: {1}]  }
   0x1   :  { %12 = vsyncpa [#allocation6], 0 }
   0x2   :  { %13 = vsyncpa [#allocation9], 0 }
   0x3   :  { %14 = vsyncpa [#allocation4], 0 }
   0x4   :  { %15 = vsyncpa [#allocation12], 0  ;;  %s2690_s18 = smov [#allocation5]   ;;  %s2691_s20 = smov [#allocation2]  }
   0x5   :  { %s33_s19 = sshll.u32 %s2690_s18, 4  ;;  %s21_s21 = sshll.u32 %s2691_s20, 4  ;;  %s34_s19 = int_to_ptr.vmem [resolvable:$true] %s33_s19  ;;  %s2735_s21 = int_to_ptr.vmem [resolvable:$true] %s21_s21 }
   0x6   :  { %s2548_s24 = scalar_lea.hbm %s3306_s1, 1024 }
   0x7   :  { %p2549_p0 = scmp.ne.s32.totalorder %s3306_s1, %s2548_s24  ;;  %p2552_p1 = scmp.lt.u32.totalorder %s2548_s24, %s3306_s1 }
   0x9   :  { %p2554_p2 = pnand %p2552_p1, %p2549_p0 }
   0xb   :  { %2557 = shalt.err (!%p2554_p2)
}
   0xc   :  { %s2558_s29 = scalar_lea.vmem %s34_s19, 1024  ;;  %p2563_p4 = scmp.lt.s32.totalorder %s34_s19, %s34_s19 }
   0xd   :  { %p2559_p3 = scmp.ne.s32.totalorder %s34_s19, %s2558_s29  ;;  %p2564_p5 = scmp.lt.s32.totalorder %s2558_s29, %s2558_s29 }
   0xf   :  { %p2565_p6 = por %p2564_p5, %p2563_p4 }
  0x11   :  { %p2566_p7 = pnand %p2565_p6, %p2559_p3 }
  0x13   :  { %2569 = shalt.err (!%p2566_p7)
}
  0x14   :  { %s2692_s30 = smov 64   ;;  %s2693_s6 = smov 4  }
  0x15   :  { %39 = dma.hbm_to_vmem [thread:$0]  %s3306_s1, 1024, %s34_s19, [#allocation6], %s2692_s30, %s2692_s30, %s2693_s6  }
  0x16   :  { %s2570_s11 = scalar_lea.hbm %s3305_s0, 1024 }
  0x17   :  { %p2571_p8 = scmp.ne.s32.totalorder %s3305_s0, %s2570_s11  ;;  %p2574_p9 = scmp.lt.u32.totalorder %s2570_s11, %s3305_s0 }
  0x19   :  { %p2576_p10 = pnand %p2574_p9, %p2571_p8 }
  0x1b   :  { %2579 = shalt.err (!%p2576_p10)
}
  0x1c   :  { %s2580_s16 = scalar_lea.vmem %s2735_s21, 1024  ;;  %p2585_p12 = scmp.lt.s32.totalorder %s2735_s21, %s2735_s21 }
  0x1d   :  { %p2581_p11 = scmp.ne.s32.totalorder %s2735_s21, %s2580_s16  ;;  %p2586_p13 = scmp.lt.s32.totalorder %s2580_s16, %s2580_s16 }
  0x1f   :  { %p2587_p0 = por %p2586_p13, %p2585_p12 }
  0x21   :  { %p2588_p1 = pnand %p2587_p0, %p2581_p11 }
  0x23   :  { %2591 = shalt.err (!%p2588_p1)
}
  0x24   :  { %27 = dma.hbm_to_vmem [thread:$0]  %s3305_s0, 1024, %s2735_s21, [#allocation3], %s2692_s30, %s2692_s30, %s2693_s6  }
  0x25   :  { %s2694_s18 = smov [#allocation7]   ;;  %s2695_s20 = smov [#allocation8]  }
  0x26   :  { %s45_s19 = sshll.u32 %s2694_s18, 4  ;;  %s57_s22 = sshll.u32 %s2695_s20, 4  ;;  %s46_s19 = int_to_ptr.vmem [resolvable:$true] %s45_s19  ;;  %s2772_s22 = int_to_ptr.vmem [resolvable:$true] %s57_s22 }
  0x27   :  { %s2592_s25 = scalar_lea.hbm %s3307_s2, 1024 }
  0x28   :  { %p2593_p2 = scmp.ne.s32.totalorder %s3307_s2, %s2592_s25  ;;  %p2596_p3 = scmp.lt.u32.totalorder %s2592_s25, %s3307_s2 }
  0x2a   :  { %p2598_p4 = pnand %p2596_p3, %p2593_p2 }
  0x2c   :  { %2601 = shalt.err (!%p2598_p4)
}
  0x2d   :  { %s2602_s0 = scalar_lea.vmem %s46_s19, 1024  ;;  %p2607_p6 = scmp.lt.s32.totalorder %s46_s19, %s46_s19 }
  0x2e   :  { %p2603_p5 = scmp.ne.s32.totalorder %s46_s19, %s2602_s0  ;;  %p2608_p7 = scmp.lt.s32.totalorder %s2602_s0, %s2602_s0 }
  0x30   :  { %p2609_p8 = por %p2608_p7, %p2607_p6 }
  0x32   :  { %p2610_p9 = pnand %p2609_p8, %p2603_p5 }
  0x34   :  { %2613 = shalt.err (!%p2610_p9)
}
  0x35   :  { %51 = dma.hbm_to_vmem [thread:$0]  %s3307_s2, 1024, %s46_s19, [#allocation6], %s2692_s30, %s2692_s30, %s2693_s6  }
  0x36   :  { %s2614_s10 = scalar_lea.hbm %s3308_s3, 256 }
  0x37   :  { %p2615_p10 = scmp.ne.s32.totalorder %s3308_s3, %s2614_s10  ;;  %p2618_p11 = scmp.lt.u32.totalorder %s2614_s10, %s3308_s3 }
  0x39   :  { %p2620_p12 = pnand %p2618_p11, %p2615_p10 }
  0x3b   :  { %2623 = shalt.err (!%p2620_p12)
}
  0x3c   :  { %s2624_s15 = scalar_lea.vmem %s2772_s22, 256  ;;  %p2629_p0 = scmp.lt.s32.totalorder %s2772_s22, %s2772_s22 }
  0x3d   :  { %p2625_p13 = scmp.ne.s32.totalorder %s2772_s22, %s2624_s15  ;;  %p2630_p1 = scmp.lt.s32.totalorder %s2624_s15, %s2624_s15 }
  0x3f   :  { %p2631_p2 = por %p2630_p1, %p2629_p0 }
  0x41   :  { %p2632_p3 = pnand %p2631_p2, %p2625_p13 }
  0x43   :  { %2635 = shalt.err (!%p2632_p3)
}
  0x44   :  { %s2696_s2 = smov 16   ;;  %s2697_s16 = smov 1  }
  0x45   :  { %63 = dma.hbm_to_vmem [thread:$0]  %s3308_s3, 256, %s2772_s22, [#allocation9], %s2696_s2, %s2696_s2, %s2697_s16  }
  0x46   :  { %2680 = dma.done.wait [#allocation3], 1024  }
  0x47   :  { %2681 = vsyncadd [#allocation3], 4294966272 }
  0x48   :  { %2682 = dma.done.wait [#allocation6], 2048  }
  0x49   :  { %2683 = vsyncadd [#allocation6], 4294965248 }
  0x4a   :  { %2684 = dma.done.wait [#allocation9], 256  }
  0x4b   :  { %2685 = vsyncadd [#allocation9], 4294967040  ;;  %v2698_v0 = vmov 0.0   ;;  %vm2699_vm0 = vmmov 0   ;;  %vm125_vm1 = vcmask 261120   ;;  %v926_v49 = vlaneseq  ;;  %s2701_s3 = smov [#allocation11]  }
  0x4c   :  { %2245 = vmatprep.subr.bf16.mxu0 %v2698_v0  ;;  %2251 = vmatprep.subr.bf16.mxu1 %v2698_v0  ;;  %v93_v1 = vld [vmem:[#allocation5] sm:$0xf]  ;;  %v94_v2 = vld [vmem:[#allocation5 + $0x4] sm:$0xf]  ;;  %v95_v5 = vld [vmem:[#allocation5 + $0x8] sm:$0xf] }
  0x4d   :  { %2247 = vmatprep.mubr.msk.bf16.mxu0 %vm2699_vm0, %v2698_v0  ;;  %2253 = vmatprep.mubr.msk.bf16.mxu1 %vm2699_vm0, %v2698_v0  ;;  %v130_v3 = vsel %vm125_vm1, %v93_v1, 0  ;;  %v176_v4 = vsel %vm125_vm1, %v94_v2, 0  ;;  %v96_v6 = vld [vmem:[#allocation5 + $0xc] sm:$0xf]  ;;  %v77_v7 = vld [vmem:[#allocation2] sm:$0xf] }
  0x4e   :  { %2246 = vmatpush3.bf16.xpose.msra.mxu0 %v130_v3  ;;  %2252 = vmatpush3.bf16.xpose.msra.mxu1 %v176_v4  ;;  %v78_v8 = vld [vmem:[#allocation2 + $0x4] sm:$0xf]  ;;  %v222_v9 = vsel %vm125_vm1, %v95_v5, 0  ;;  %v268_v10 = vsel %vm125_vm1, %v96_v6, 0  ;;  %v97_v11 = vld [vmem:[#allocation5 + $0x10] sm:$0xf] }
  0x4f   :  { %2257 = vmatprep.subr.bf16.mxu0 %v2698_v0  ;;  %2263 = vmatprep.subr.bf16.mxu1 %v2698_v0  ;;  %v98_v12 = vld [vmem:[#allocation5 + $0x14] sm:$0xf]  ;;  %v79_v13 = vld [vmem:[#allocation2 + $0x8] sm:$0xf]  ;;  %v80_v14 = vld [vmem:[#allocation2 + $0xc] sm:$0xf] }
  0x50   :  { %v314_v15 = vsel %vm125_vm1, %v97_v11, 0  ;;  %v360_v16 = vsel %vm125_vm1, %v98_v12, 0  ;;  %v99_v17 = vld [vmem:[#allocation5 + $0x18] sm:$0xf]  ;;  %v100_v18 = vld [vmem:[#allocation5 + $0x1c] sm:$0xf] }
  0x51   :  { %v81_v19 = vld [vmem:[#allocation2 + $0x10] sm:$0xf]  ;;  %v82_v20 = vld [vmem:[#allocation2 + $0x14] sm:$0xf]  ;;  %v406_v21 = vsel %vm125_vm1, %v99_v17, 0  ;;  %v452_v22 = vsel %vm125_vm1, %v100_v18, 0 }
  0x52   :  { %v101_v23 = vld [vmem:[#allocation5 + $0x20] sm:$0xf]  ;;  %v102_v24 = vld [vmem:[#allocation5 + $0x24] sm:$0xf]  ;;  %v83_v25 = vld [vmem:[#allocation2 + $0x18] sm:$0xf] }
  0x53   :  { %v84_v26 = vld [vmem:[#allocation2 + $0x1c] sm:$0xf]  ;;  %v498_v27 = vsel %vm125_vm1, %v101_v23, 0  ;;  %v544_v28 = vsel %vm125_vm1, %v102_v24, 0  ;;  %v103_v29 = vld [vmem:[#allocation5 + $0x28] sm:$0xf] }
  0x54   :  { %v104_v30 = vld [vmem:[#allocation5 + $0x2c] sm:$0xf]  ;;  %v85_v31 = vld [vmem:[#allocation2 + $0x20] sm:$0xf]  ;;  %v86_v32 = vld [vmem:[#allocation2 + $0x24] sm:$0xf] }
  0x55   :  { %2248 = vmatmul.mubr.msk.bf16.vlgmr.msra.gmra.mrb[0].mxu0 %vm125_vm1, %v77_v7  ;;  %2254 = vmatmul.mubr.msk.bf16.vlgmr.msra.gmra.mrb[0].mxu1 %vm125_vm1, %v78_v8  ;;  %v590_v33 = vsel %vm125_vm1, %v103_v29, 0  ;;  %v636_v34 = vsel %vm125_vm1, %v104_v30, 0  ;;  %v105_v35 = vld [vmem:[#allocation5 + $0x30] sm:$0xf]  ;;  %v106_v36 = vld [vmem:[#allocation5 + $0x34] sm:$0xf] }
  0x56   :  { %2258 = vmatpush3.bf16.xpose.msra.mxu0 %v222_v9  ;;  %2264 = vmatpush3.bf16.xpose.msra.mxu1 %v268_v10  ;;  %v87_v37 = vld [vmem:[#allocation2 + $0x28] sm:$0xf]  ;;  %v88_v38 = vld [vmem:[#allocation2 + $0x2c] sm:$0xf]  ;;  %v682_v39 = vsel %vm125_vm1, %v105_v35, 0  ;;  %v728_v40 = vsel %vm125_vm1, %v106_v36, 0 }
  0x57   :  { %2259 = vmatprep.mubr.msk.bf16.mxu0 %vm2699_vm0, %v2698_v0  ;;  %2265 = vmatprep.mubr.msk.bf16.mxu1 %vm2699_vm0, %v2698_v0  ;;  %v107_v41 = vld [vmem:[#allocation5 + $0x38] sm:$0xf]  ;;  %v108_v42 = vld [vmem:[#allocation5 + $0x3c] sm:$0xf]  ;;  %v89_v43 = vld [vmem:[#allocation2 + $0x30] sm:$0xf] }
  0x58   :  { %2269 = vmatprep.subr.bf16.mxu0 %v2698_v0  ;;  %2275 = vmatprep.subr.bf16.mxu1 %v2698_v0  ;;  %v90_v44 = vld [vmem:[#allocation2 + $0x34] sm:$0xf]  ;;  %v774_v45 = vsel %vm125_vm1, %v107_v41, 0  ;;  %v820_v46 = vsel %vm125_vm1, %v108_v42, 0  ;;  %v91_v47 = vld [vmem:[#allocation2 + $0x38] sm:$0xf] }
  0x59   :  { %v92_v48 = vld [vmem:[#allocation2 + $0x3c] sm:$0xf]  ;;  %v878_v50 = vld [vmem:[#allocation8] sm:$0x1]  ;;  %v927_v51 = vshrl.u32 %v926_v49, 7  ;;  %v2700_v54 = vmov 0  }
  0x5a   :  { %v879_v52 = vld [vmem:[#allocation8 + $0x1] sm:$0x1]  ;;  %vm894_vm2 = vcmp.gt.f32.partialorder %v878_v50, 0.5  ;;  %v880_v57 = vld [vmem:[#allocation8 + $0x2] sm:$0x1]  ;;  %vm1022_vm7 = vcmask 64512  }
  0x5b   :  { %vm895_vm3 = vcmp.gt.f32.partialorder %v879_v52, 0.5  ;;  %v2892_v53 = vsub.s32 0, %v927_v51  ;;  %v910_v55 = vsel %vm894_vm2, 1, %v2700_v54  ;;  %v881_v58 = vld [vmem:[#allocation8 + $0x3] sm:$0x1]  ;;  %vm896_vm4 = vcmp.gt.f32.partialorder %v880_v57, 0.5 }
  0x5c   :  { %v911_v56 = vsel %vm895_vm3, 1, %v2700_v54  ;;  %vm897_vm5 = vcmp.gt.f32.partialorder %v881_v58, 0.5  ;;  %v912_v1 = vsel %vm896_vm4, 1, %v2700_v54  ;;  %v883_v9 = vld [vmem:[#allocation8 + $0x5] sm:$0x1]  ;;  %s2131_s18 = sshll.u32 %s2701_s3, 4  ;;  %s2132_s18 = int_to_ptr.vmem [resolvable:$true] %s2131_s18 }
  0x5d   :  { %2260 = vmatmul.mubr.msk.bf16.vlgmr.msra.gmra.mrb[4].mxu0 %vm125_vm1, %v79_v13  ;;  %2266 = vmatmul.mubr.msk.bf16.vlgmr.msra.gmra.mrb[4].mxu1 %vm125_vm1, %v80_v14  ;;  %v929_v59 = vrot.slane %v910_v55, %v2892_v53  ;;  %v933_v60 = vrot.slane %v911_v56, %v2892_v53  ;;  %v913_v2 = vsel %vm897_vm5, 1, %v2700_v54  ;;  %v882_v10 = vld [vmem:[#allocation8 + $0x4] sm:$0x1]  ;;  %vm899_vm9 = vcmp.gt.f32.partialorder %v883_v9, 0.5  ;;  %v885_v29 = vld [vmem:[#allocation8 + $0x7] sm:$0x1]  ;;  %p2641_p5 = scmp.lt.s32.totalorder %s2132_s18, %s2132_s18 }
  0x5e   :  { %2270 = vmatpush3.bf16.xpose.msra.mxu0 %v314_v15  ;;  %2276 = vmatpush3.bf16.xpose.msra.mxu1 %v360_v16  ;;  %v937_v16 = vrot.slane %v912_v1, %v2892_v53  ;;  %v941_v17 = vrot.slane %v913_v2, %v2892_v53  ;;  %vm898_vm10 = vcmp.gt.f32.partialorder %v882_v10, 0.5  ;;  %v884_v30 = vld [vmem:[#allocation8 + $0x6] sm:$0x1]  ;;  %vm901_vm13 = vcmp.gt.f32.partialorder %v885_v29, 0.5  ;;  %v887_v49 = vld [vmem:[#allocation8 + $0x9] sm:$0x1] }
  0x5f   :  { %2271 = vmatprep.mubr.msk.bf16.mxu0 %vm2699_vm0, %v2698_v0  ;;  %2277 = vmatprep.mubr.msk.bf16.mxu1 %vm2699_vm0, %v2698_v0  ;;  %vm2898_vm6 = vcmp.eq.s32.totalorder %v929_v59, 1  ;;  %vm991_vm8 = vcmp.eq.s32.totalorder %v933_v60, 1  ;;  %vm900_vm14 = vcmp.gt.f32.partialorder %v884_v30, 0.5  ;;  %v917_v41 = vsel %vm901_vm13, 1, %v2700_v54  ;;  %v886_v50 = vld [vmem:[#allocation8 + $0x8] sm:$0x1] }
  0x60   :  { %2281 = vmatprep.subr.bf16.mxu0 %v2698_v0  ;;  %2287 = vmatprep.subr.bf16.mxu1 %v2698_v0  ;;  %vm992_vm11 = vcmp.eq.s32.totalorder %v937_v16, 1  ;;  %vm993_vm12 = vcmp.eq.s32.totalorder %v941_v17, 1  ;;  %v916_v42 = vsel %vm900_vm14, 1, %v2700_v54  ;;  %v957_v59 = vrot.slane %v917_v41, %v2892_v53  ;;  %v888_v9 = vld [vmem:[#allocation8 + $0xa] sm:$0x1]  ;;  %s2636_s19 = scalar_lea.vmem %s2132_s18, 2048 }
  0x61   :  { %v953_v60 = vrot.slane %v916_v42, %v2892_v53  ;;  %vm903_vm2 = vcmp.gt.f32.partialorder %v887_v49, 0.5  ;;  %vm902_vm3 = vcmp.gt.f32.partialorder %v886_v50, 0.5  ;;  %v891_v30 = vld [vmem:[#allocation8 + $0xd] sm:$0x1]  ;;  %p2637_p4 = scmp.ne.s32.totalorder %s2132_s18, %s2636_s19  ;;  %p2642_p6 = scmp.lt.s32.totalorder %s2636_s19, %s2636_s19 }
  0x62   :  { %vm997_vm4 = vcmp.eq.s32.totalorder %v957_v59, 1  ;;  %v918_v1 = vsel %vm902_vm3, 1, %v2700_v54 }
  0x63   :  { %vm996_vm5 = vcmp.eq.s32.totalorder %v953_v60, 1  ;;  %p2643_p7 = por %p2642_p6, %p2641_p5 }
  0x65   :  { %2272 = vmatmul.mubr.msk.bf16.vlgmr.msra.gmra.mrb[8].mxu0 %vm125_vm1, %v81_v19  ;;  %2278 = vmatmul.mubr.msk.bf16.vlgmr.msra.gmra.mrb[8].mxu1 %vm125_vm1, %v82_v20  ;;  %p2644_p8 = pnand %p2643_p7, %p2637_p4 }
  0x66   :  { %2282 = vmatpush3.bf16.xpose.msra.mxu0 %v406_v21  ;;  %2288 = vmatpush3.bf16.xpose.msra.mxu1 %v452_v22  ;;  %v915_v21 = vsel %vm899_vm9, 1, %v2700_v54  ;;  %v914_v22 = vsel %vm898_vm10, 1, %v2700_v54 }
  0x67   :  { %2283 = vmatprep.mubr.msk.bf16.mxu0 %vm2699_vm0, %v2698_v0  ;;  %2289 = vmatprep.mubr.msk.bf16.mxu1 %vm2699_vm0, %v2698_v0  ;;  %v949_v36 = vrot.slane %v915_v21, %v2892_v53 }
  0x68   :  { %2293 = vmatprep.subr.bf16.mxu0 %v2698_v0  ;;  %2299 = vmatprep.subr.bf16.mxu1 %v2698_v0 }
  0x69   :  { %vm995_vm15 = vcmp.eq.s32.totalorder %v949_v36, 1 }
  0x6d   :  { %2284 = vmatmul.mubr.msk.bf16.vlgmr.msra.gmra.mrb[12].mxu0 %vm125_vm1, %v83_v25  ;;  %2290 = vmatmul.mubr.msk.bf16.vlgmr.msra.gmra.mrb[12].mxu1 %vm125_vm1, %v84_v26 }
  0x6e   :  { %2294 = vmatpush3.bf16.xpose.msra.mxu0 %v498_v27  ;;  %2300 = vmatpush3.bf16.xpose.msra.mxu1 %v544_v28 }
  0x6f   :  { %2295 = vmatprep.mubr.msk.bf16.mxu0 %vm2699_vm0, %v2698_v0  ;;  %2301 = vmatprep.mubr.msk.bf16.mxu1 %vm2699_vm0, %v2698_v0 }
  0x70   :  { %2305 = vmatprep.subr.bf16.mxu0 %v2698_v0  ;;  %2311 = vmatprep.subr.bf16.mxu1 %v2698_v0 }
  0x75   :  { %2296 = vmatmul.mubr.msk.bf16.vlgmr.msra.gmra.mrb[16].mxu0 %vm125_vm1, %v85_v31  ;;  %2302 = vmatmul.mubr.msk.bf16.vlgmr.msra.gmra.mrb[16].mxu1 %vm125_vm1, %v86_v32 }
  0x76   :  { %2306 = vmatpush3.bf16.xpose.msra.mxu0 %v590_v33  ;;  %2312 = vmatpush3.bf16.xpose.msra.mxu1 %v636_v34 }
  0x77   :  { %2307 = vmatprep.mubr.msk.bf16.mxu0 %vm2699_vm0, %v2698_v0  ;;  %2313 = vmatprep.mubr.msk.bf16.mxu1 %vm2699_vm0, %v2698_v0 }
  0x78   :  { %2317 = vmatprep.subr.bf16.mxu0 %v2698_v0  ;;  %2323 = vmatprep.subr.bf16.mxu1 %v2698_v0 }
  0x7d   :  { %2308 = vmatmul.mubr.msk.bf16.vlgmr.msra.gmra.mrb[20].mxu0 %vm125_vm1, %v87_v37  ;;  %2314 = vmatmul.mubr.msk.bf16.vlgmr.msra.gmra.mrb[20].mxu1 %vm125_vm1, %v88_v38  ;;  %v945_v37 = vrot.slane %v914_v22, %v2892_v53 }
  0x7e   :  { %2318 = vmatpush3.bf16.xpose.msra.mxu0 %v682_v39  ;;  %2324 = vmatpush3.bf16.xpose.msra.mxu1 %v728_v40 }
  0x7f   :  { %2319 = vmatprep.mubr.msk.bf16.mxu0 %vm2699_vm0, %v2698_v0  ;;  %2325 = vmatprep.mubr.msk.bf16.mxu1 %vm2699_vm0, %v2698_v0 }
  0x80   :  { %2329 = vmatprep.subr.bf16.mxu0 %v2698_v0  ;;  %2335 = vmatprep.subr.bf16.mxu1 %v2698_v0 }
  0x85   :  { %2320 = vmatmul.mubr.msk.bf16.vlgmr.msra.gmra.mrb[24].mxu0 %vm125_vm1, %v89_v43  ;;  %2326 = vmatmul.mubr.msk.bf16.vlgmr.msra.gmra.mrb[24].mxu1 %vm125_vm1, %v90_v44 }
  0x86   :  { %2330 = vmatpush3.bf16.xpose.msra.mxu0 %v774_v45  ;;  %2336 = vmatpush3.bf16.xpose.msra.mxu1 %v820_v46 }
  0x87   :  { %2331 = vmatprep.mubr.msk.bf16.mxu0 %vm2699_vm0, %v2698_v0  ;;  %2337 = vmatprep.mubr.msk.bf16.mxu1 %vm2699_vm0, %v2698_v0 }
  0x88   :  { %2341 = vmatprep.subr.bf16.mxu0 %v2698_v0  ;;  %2347 = vmatprep.subr.bf16.mxu1 %v2698_v0 }
  0x8d   :  { %2332 = vmatmul.mubr.msk.bf16.vlgmr.msra.gmra.mrb[28].mxu0 %vm125_vm1, %v91_v47  ;;  %2338 = vmatmul.mubr.msk.bf16.vlgmr.msra.gmra.mrb[28].mxu1 %vm125_vm1, %v92_v48  ;;  %vm994_vm1 = vcmp.eq.s32.totalorder %v945_v37, 1 }
  0x8e   :  { %2343 = vmatprep.mubr.msk.bf16.mxu0 %vm2699_vm0, %v2698_v0  ;;  %2349 = vmatprep.mubr.msk.bf16.mxu1 %vm2699_vm0, %v2698_v0 }
 0x128   :  { %v166_v62 = vpop.f32.mrb[0].mxu0  ;;  %v212_v63 = vpop.f32.mrb[0].mxu1 }
 0x129   :  { %v862_v3 = vmul.f32 0.17677669, %v166_v62  ;;  %v2249_v4 = vpop.f32.mrb[1].mxu0  ;;  %v863_v5 = vmul.f32 0.17677669, %v212_v63  ;;  %v2255_v6 = vpop.f32.mrb[1].mxu1 }
 0x12a   :  { %v169_v7 = vpop.f32.mrb[2].mxu0  ;;  %v215_v8 = vpop.f32.mrb[2].mxu1  ;;  %v919_v63 = vsel %vm903_vm2, 1, %v2700_v54 }
 0x12b   :  { %v2250_v11 = vpop.f32.mrb[3].mxu0  ;;  %v2256_v12 = vpop.f32.mrb[3].mxu1  ;;  %v2906_v13 = vsel %vm2898_vm6, %v862_v3, -3.4028235e+38  ;;  %v2908_v14 = vsel %vm991_vm8, %v863_v5, -3.4028235e+38 }
 0x12c   :  { %v1023_v15 = vsel %vm1022_vm7, %v2906_v13, -inf  ;;  %v1026_v18 = vsel %vm1022_vm7, %v2908_v14, -inf  ;;  %v889_v8 = vld [vmem:[#allocation8 + $0xb] sm:$0x1]  ;;  %vm904_vm8 = vcmp.gt.f32.partialorder %v888_v9, 0.5 }
 0x12d   :  { %1024 = vmax.xlane.f32.xlu0 %v1023_v15  ;;  %vm905_vm6 = vcmp.gt.f32.partialorder %v889_v8, 0.5 }
 0x12e   :  { %v921_v22 = vsel %vm905_vm6, 1, %v2700_v54  ;;  %vm1330_vm6 = vcmask 1043456  }
 0x130   :  { %v258_v19 = vpop.f32.mrb[4].mxu0  ;;  %v304_v20 = vpop.f32.mrb[4].mxu1 }
 0x131   :  { %v864_v23 = vmul.f32 0.17677669, %v258_v19  ;;  %1027 = vmax.xlane.f32.xlu0 %v1026_v18  ;;  %v2261_v24 = vpop.f32.mrb[5].mxu0  ;;  %v865_v25 = vmul.f32 0.17677669, %v304_v20  ;;  %v2267_v26 = vpop.f32.mrb[5].mxu1  ;;  %v965_v18 = vrot.slane %v919_v63, %v2892_v53  ;;  %v961_v19 = vrot.slane %v918_v1, %v2892_v53 }
 0x132   :  { %v261_v27 = vpop.f32.mrb[6].mxu0  ;;  %v307_v28 = vpop.f32.mrb[6].mxu1 }
 0x133   :  { %v2262_v31 = vpop.f32.mrb[7].mxu0  ;;  %v2268_v32 = vpop.f32.mrb[7].mxu1  ;;  %v2918_v33 = vsel %vm992_vm11, %v864_v23, -3.4028235e+38  ;;  %v2920_v34 = vsel %vm993_vm12, %v865_v25, -3.4028235e+38 }
 0x134   :  { %v1029_v35 = vsel %vm1022_vm7, %v2918_v33, -inf  ;;  %v1032_v38 = vsel %vm1022_vm7, %v2920_v34, -inf  ;;  %vm999_vm9 = vcmp.eq.s32.totalorder %v965_v18, 1  ;;  %vm998_vm10 = vcmp.eq.s32.totalorder %v961_v19, 1  ;;  %v890_v31 = vld [vmem:[#allocation8 + $0xc] sm:$0x1] }
 0x135   :  { %1030 = vmax.xlane.f32.xlu1 %v1029_v35  ;;  %v920_v23 = vsel %vm904_vm8, 1, %v2700_v54  ;;  %vm907_vm11 = vcmp.gt.f32.partialorder %v891_v30, 0.5  ;;  %vm906_vm12 = vcmp.gt.f32.partialorder %v890_v31, 0.5  ;;  %vm2097_vm8 = vcmask 7168  }
 0x136   :  { %v969_v41 = vrot.slane %v920_v23, %v2892_v53 }
 0x138   :  { %v350_v39 = vpop.f32.mrb[8].mxu0  ;;  %v396_v40 = vpop.f32.mrb[8].mxu1  ;;  %vm1000_vm14 = vcmp.eq.s32.totalorder %v969_v41, 1 }
 0x139   :  { %v866_v43 = vmul.f32 0.17677669, %v350_v39  ;;  %v867_v44 = vmul.f32 0.17677669, %v396_v40  ;;  %1033 = vmax.xlane.f32.xlu1 %v1032_v38  ;;  %v2273_v45 = vpop.f32.mrb[9].mxu0  ;;  %v2279_v46 = vpop.f32.mrb[9].mxu1  ;;  %v973_v40 = vrot.slane %v921_v22, %v2892_v53 }
 0x13a   :  { %v353_v47 = vpop.f32.mrb[10].mxu0  ;;  %v399_v48 = vpop.f32.mrb[10].mxu1  ;;  %v922_v45 = vsel %vm906_vm12, 1, %v2700_v54 }
 0x13b   :  { %v2280_v51 = vpop.f32.mrb[11].mxu1  ;;  %v2930_v52 = vsel %vm995_vm15, %v867_v44, -3.4028235e+38  ;;  %v2932_v55 = vsel %vm994_vm1, %v866_v43, -3.4028235e+38  ;;  %v2274_v56 = vpop.f32.mrb[11].mxu0 }
 0x13c   :  { %v1038_v57 = vsel %vm1022_vm7, %v2930_v52, -inf  ;;  %v1035_v58 = vsel %vm1022_vm7, %v2932_v55, -inf  ;;  %vm1001_vm13 = vcmp.eq.s32.totalorder %v973_v40, 1  ;;  %v923_v44 = vsel %vm907_vm11, 1, %v2700_v54  ;;  %v893_v56 = vld [vmem:[#allocation8 + $0xf] sm:$0x1] }
 0x13d   :  { %1039 = vmax.xlane.f32.xlu1 %v1038_v57  ;;  %1036 = vmax.xlane.f32.xlu0 %v1035_v58  ;;  %v892_v57 = vld [vmem:[#allocation8 + $0xe] sm:$0x1]  ;;  %v981_v1 = vrot.slane %v923_v44, %v2892_v53  ;;  %vm909_vm15 = vcmp.gt.f32.partialorder %v893_v56, 0.5 }
 0x13e   :  { %vm908_vm1 = vcmp.gt.f32.partialorder %v892_v57, 0.5 }
 0x13f   :  { %vm1003_vm2 = vcmp.eq.s32.totalorder %v981_v1, 1 }
 0x140   :  { %v442_v61 = vpop.f32.mrb[12].mxu0  ;;  %v488_v62 = vpop.f32.mrb[12].mxu1 }
 0x141   :  { %v868_v2 = vmul.f32 0.17677669, %v442_v61  ;;  %v869_v3 = vmul.f32 0.17677669, %v488_v62  ;;  %v2285_v4 = vpop.f32.mrb[13].mxu0  ;;  %v2291_v5 = vpop.f32.mrb[13].mxu1 }
 0x142   :  { %v445_v6 = vpop.f32.mrb[14].mxu0  ;;  %v491_v7 = vpop.f32.mrb[14].mxu1  ;;  %v925_v5 = vsel %vm909_vm15, 1, %v2700_v54 }
 0x143   :  { %v2292_v10 = vpop.f32.mrb[15].mxu1  ;;  %v2942_v11 = vsel %vm997_vm4, %v869_v3, -3.4028235e+38  ;;  %v2944_v12 = vsel %vm996_vm5, %v868_v2, -3.4028235e+38  ;;  %v2286_v15 = vpop.f32.mrb[15].mxu0  ;;  %v977_v2 = vrot.slane %v922_v45, %v2892_v53 }
 0x144   :  { %v1044_v16 = vsel %vm1022_vm7, %v2942_v11, -inf  ;;  %v1041_v17 = vsel %vm1022_vm7, %v2944_v12, -inf  ;;  %v924_v6 = vsel %vm908_vm1, 1, %v2700_v54  ;;  %v989_v54 = vrot.slane %v925_v5, %v2892_v53 }
 0x145   :  { %1045 = vmax.xlane.f32.xlu1 %v1044_v16  ;;  %1042 = vmax.xlane.f32.xlu0 %v1041_v17  ;;  %vm1002_vm3 = vcmp.eq.s32.totalorder %v977_v2, 1  ;;  %v985_v23 = vrot.slane %v924_v6, %v2892_v53 }
 0x146   :  { %vm1005_vm4 = vcmp.eq.s32.totalorder %v989_v54, 1 }
 0x147   :  { %vm1004_vm5 = vcmp.eq.s32.totalorder %v985_v23, 1 }
 0x148   :  { %v534_v20 = vpop.f32.mrb[16].mxu0  ;;  %v580_v21 = vpop.f32.mrb[16].mxu1 }
 0x149   :  { %v870_v24 = vmul.f32 0.17677669, %v534_v20  ;;  %v871_v25 = vmul.f32 0.17677669, %v580_v21  ;;  %v2297_v26 = vpop.f32.mrb[17].mxu0  ;;  %v2303_v27 = vpop.f32.mrb[17].mxu1 }
 0x14a   :  { %v537_v28 = vpop.f32.mrb[18].mxu0  ;;  %v583_v29 = vpop.f32.mrb[18].mxu1 }
 0x14b   :  { %v2304_v32 = vpop.f32.mrb[19].mxu1  ;;  %v2954_v35 = vsel %vm999_vm9, %v871_v25, -3.4028235e+38  ;;  %v2956_v36 = vsel %vm998_vm10, %v870_v24, -3.4028235e+38  ;;  %v2298_v37 = vpop.f32.mrb[19].mxu0 }
 0x14c   :  { %v1050_v38 = vsel %vm1022_vm7, %v2954_v35, -inf  ;;  %v1047_v39 = vsel %vm1022_vm7, %v2956_v36, -inf }
 0x14d   :  { %1051 = vmax.xlane.f32.xlu1 %v1050_v38  ;;  %1048 = vmax.xlane.f32.xlu0 %v1047_v39 }
 0x150   :  { %v626_v42 = vpop.f32.mrb[20].mxu0  ;;  %v672_v43 = vpop.f32.mrb[20].mxu1 }
 0x151   :  { %v872_v46 = vmul.f32 0.17677669, %v626_v42  ;;  %v873_v47 = vmul.f32 0.17677669, %v672_v43  ;;  %v2309_v48 = vpop.f32.mrb[21].mxu0  ;;  %v2315_v49 = vpop.f32.mrb[21].mxu1 }
 0x152   :  { %v629_v50 = vpop.f32.mrb[22].mxu0  ;;  %v675_v51 = vpop.f32.mrb[22].mxu1 }
 0x153   :  { %v2316_v58 = vpop.f32.mrb[23].mxu1  ;;  %v2966_v59 = vsel %vm1001_vm13, %v873_v47, -3.4028235e+38  ;;  %v2968_v60 = vsel %vm1000_vm14, %v872_v46, -3.4028235e+38  ;;  %v2310_v61 = vpop.f32.mrb[23].mxu0 }
 0x154   :  { %v1056_v62 = vsel %vm1022_vm7, %v2966_v59, -inf  ;;  %v1053_v63 = vsel %vm1022_vm7, %v2968_v60, -inf }
 0x155   :  { %1057 = vmax.xlane.f32.xlu1 %v1056_v62  ;;  %1054 = vmax.xlane.f32.xlu0 %v1053_v63 }
 0x158   :  { %v718_v3 = vpop.f32.mrb[24].mxu0  ;;  %v764_v4 = vpop.f32.mrb[24].mxu1 }
 0x159   :  { %v874_v7 = vmul.f32 0.17677669, %v718_v3  ;;  %v875_v8 = vmul.f32 0.17677669, %v764_v4  ;;  %v2321_v9 = vpop.f32.mrb[25].mxu0  ;;  %v2327_v10 = vpop.f32.mrb[25].mxu1 }
 0x15a   :  { %v721_v15 = vpop.f32.mrb[26].mxu0  ;;  %v767_v16 = vpop.f32.mrb[26].mxu1 }
 0x15b   :  { %v2328_v17 = vpop.f32.mrb[27].mxu1  ;;  %v2978_v18 = vsel %vm1003_vm2, %v875_v8, -3.4028235e+38  ;;  %v2980_v19 = vsel %vm1002_vm3, %v874_v7, -3.4028235e+38  ;;  %v2322_v20 = vpop.f32.mrb[27].mxu0 }
 0x15c   :  { %v1062_v21 = vsel %vm1022_vm7, %v2978_v18, -inf  ;;  %v1059_v22 = vsel %vm1022_vm7, %v2980_v19, -inf }
 0x15d   :  { %1063 = vmax.xlane.f32.xlu1 %v1062_v21  ;;  %1060 = vmax.xlane.f32.xlu0 %v1059_v22 }
 0x160   :  { %v810_v24 = vpop.f32.mrb[28].mxu0  ;;  %v856_v25 = vpop.f32.mrb[28].mxu1 }
 0x161   :  { %v876_v26 = vmul.f32 0.17677669, %v810_v24  ;;  %v877_v27 = vmul.f32 0.17677669, %v856_v25  ;;  %v2333_v28 = vpop.f32.mrb[29].mxu0  ;;  %v2339_v29 = vpop.f32.mrb[29].mxu1 }
 0x162   :  { %v813_v30 = vpop.f32.mrb[30].mxu0  ;;  %v859_v31 = vpop.f32.mrb[30].mxu1 }
 0x163   :  { %v2340_v32 = vpop.f32.mrb[31].mxu1  ;;  %v2988_v37 = vsel %vm1005_vm4, %v877_v27, -3.4028235e+38  ;;  %v2990_v38 = vsel %vm1004_vm5, %v876_v26, -3.4028235e+38  ;;  %v2334_v39 = vpop.f32.mrb[31].mxu0 }
 0x164   :  { %v1068_v53 = vsel %vm1022_vm7, %v2988_v37, -inf  ;;  %v1065_v40 = vsel %vm1022_vm7, %v2990_v38, -inf  ;;  %v109_v31 = vld [vmem:[#allocation7] sm:$0xf] }
 0x165   :  { %1069 = vmax.xlane.f32.xlu1 %v1068_v53  ;;  %1066 = vmax.xlane.f32.xlu0 %v1065_v40  ;;  %v1332_v32 = vsel %vm1330_vm6, %v109_v31, 0 }
 0x166   :  { %2342 = vmatpush3.bf16.msra.mxu0 %v1332_v32 }
 0x167   :  { %2353 = vmatprep.subr.bf16.mxu0 %v2698_v0 }
 0x1ba   :  { %v2996_v41 = vpop.xlane.xlu0 %1024 }
 0x1bb   :  { %v1071_v42 = vsub.f32 %v2906_v13, %v2996_v41  ;;  %vm1247_vm9 = vcmp.le.f32.partialorder %v2996_v41, -3.4028235e+38 }
 0x1bd   :  { %v1087_v43 = vmul.f32 1.442695, %v1071_v42  ;;  %v110_v42 = vld [vmem:[#allocation7 + $0x4] sm:$0xf] }
 0x1be   :  { %v3000_v44 = vpop.xlane.xlu0 %1027 }
 0x1bf   :  { %2452 = vpow2.f32 %v1087_v43  ;;  %v1072_v45 = vsub.f32 %v2908_v14, %v3000_v44  ;;  %vm1248_vm10 = vcmp.le.f32.partialorder %v3000_v44, -3.4028235e+38 }
 0x1c1   :  { %v1089_v46 = vmul.f32 1.442695, %v1072_v45 }
 0x1c2   :  { %v3004_v47 = vpop.xlane.xlu1 %1030 }
 0x1c3   :  { %2454 = vpow2.f32 %v1089_v46  ;;  %v1073_v48 = vsub.f32 %v2918_v33, %v3004_v47  ;;  %vm1249_vm11 = vcmp.le.f32.partialorder %v3004_v47, -3.4028235e+38 }
 0x1c5   :  { %v1091_v49 = vmul.f32 1.442695, %v1073_v48  ;;  %v1378_v48 = vsel %vm1330_vm6, %v110_v42, 0 }
 0x1c6   :  { %v3008_v50 = vpop.xlane.xlu1 %1033  ;;  %2348 = vmatpush3.bf16.msra.mxu1 %v1378_v48 }
 0x1c7   :  { %2456 = vpow2.f32 %v1091_v49  ;;  %v1074_v13 = vsub.f32 %v2920_v34, %v3008_v50  ;;  %2359 = vmatprep.subr.bf16.mxu1 %v2698_v0  ;;  %vm1250_vm12 = vcmp.le.f32.partialorder %v3008_v50, -3.4028235e+38 }
 0x1c9   :  { %v3012_v51 = vpop.eup %2452  ;;  %v1093_v56 = vmul.f32 1.442695, %v1074_v13 }
 0x1ca   :  { %v3014_v57 = vpop.xlane.xlu1 %1039  ;;  %v3016_v14 = vpop.xlane.xlu0 %1036  ;;  %v1119_v58 = vsel %vm1022_vm7, %v3012_v51, 0.0 }
 0x1cb   :  { %2458 = vpow2.f32 %v1093_v56  ;;  %v1076_v33 = vsub.f32 %v2930_v52, %v3014_v57  ;;  %v1075_v61 = vsub.f32 %v2932_v55, %v3016_v14  ;;  %1120 = vadd.xlane.f32.xlu0 %v1119_v58  ;;  %vm1252_vm13 = vcmp.le.f32.partialorder %v3014_v57, -3.4028235e+38 }
 0x1cc   :  { %vm1251_vm14 = vcmp.le.f32.partialorder %v3016_v14, -3.4028235e+38 }
 0x1cd   :  { %v3024_v62 = vpop.eup %2454  ;;  %v1097_v34 = vmul.f32 1.442695, %v1076_v33  ;;  %v1095_v63 = vmul.f32 1.442695, %v1075_v61 }
 0x1ce   :  { %v1122_v1 = vsel %vm1022_vm7, %v3024_v62, 0.0 }
 0x1cf   :  { %2460 = vpow2.f32 %v1097_v34  ;;  %1123 = vadd.xlane.f32.xlu1 %v1122_v1 }
 0x1d0   :  { %2462 = vpow2.f32 %v1095_v63 }
 0x1d1   :  { %v3028_v2 = vpop.eup %2456 }
 0x1d2   :  { %v3030_v3 = vpop.xlane.xlu1 %1045  ;;  %v3032_v4 = vpop.xlane.xlu0 %1042  ;;  %v1125_v52 = vsel %vm1022_vm7, %v3028_v2, 0.0 }
 0x1d3   :  { %v1078_v55 = vsub.f32 %v2942_v11, %v3030_v3  ;;  %v1077_v5 = vsub.f32 %v2944_v12, %v3032_v4  ;;  %1126 = vadd.xlane.f32.xlu0 %v1125_v52  ;;  %vm1254_vm15 = vcmp.le.f32.partialorder %v3030_v3, -3.4028235e+38  ;;  %vm1253_vm1 = vcmp.le.f32.partialorder %v3032_v4, -3.4028235e+38 }
 0x1d5   :  { %v3040_v6 = vpop.eup %2458  ;;  %v1101_v7 = vmul.f32 1.442695, %v1078_v55  ;;  %v1099_v8 = vmul.f32 1.442695, %v1077_v5 }
 0x1d6   :  { %v1128_v9 = vsel %vm1022_vm7, %v3040_v6, 0.0 }
 0x1d7   :  { %2464 = vpow2.f32 %v1101_v7  ;;  %1129 = vadd.xlane.f32.xlu1 %v1128_v9 }
 0x1d8   :  { %2466 = vpow2.f32 %v1099_v8 }
 0x1d9   :  { %v3044_v10 = vpop.eup %2460 }
 0x1da   :  { %v3046_v15 = vpop.eup %2462  ;;  %v3048_v16 = vpop.xlane.xlu1 %1051  ;;  %v1134_v12 = vsel %vm1022_vm7, %v3044_v10, 0.0 }
 0x1db   :  { %v3050_v11 = vpop.xlane.xlu0 %1048  ;;  %v1080_v17 = vsub.f32 %v2954_v35, %v3048_v16  ;;  %1135 = vadd.xlane.f32.xlu1 %v1134_v12  ;;  %v1131_v21 = vsel %vm1022_vm7, %v3046_v15, 0.0  ;;  %vm1256_vm2 = vcmp.le.f32.partialorder %v3048_v16, -3.4028235e+38 }
 0x1dc   :  { %v1079_v20 = vsub.f32 %v2956_v36, %v3050_v11  ;;  %1132 = vadd.xlane.f32.xlu0 %v1131_v21  ;;  %vm1255_vm3 = vcmp.le.f32.partialorder %v3050_v11, -3.4028235e+38 }
 0x1dd   :  { %v1105_v22 = vmul.f32 1.442695, %v1080_v17 }
 0x1de   :  { %v1103_v54 = vmul.f32 1.442695, %v1079_v20 }
 0x1df   :  { %2468 = vpow2.f32 %v1105_v22 }
 0x1e0   :  { %2470 = vpow2.f32 %v1103_v54 }
 0x1e1   :  { %v3060_v23 = vpop.eup %2464 }
 0x1e2   :  { %v3062_v24 = vpop.eup %2466  ;;  %v3064_v25 = vpop.xlane.xlu1 %1057  ;;  %v1140_v35 = vsel %vm1022_vm7, %v3060_v23, 0.0 }
 0x1e3   :  { %v3066_v26 = vpop.xlane.xlu0 %1054  ;;  %v1082_v36 = vsub.f32 %v2966_v59, %v3064_v25  ;;  %1141 = vadd.xlane.f32.xlu1 %v1140_v35  ;;  %v1137_v28 = vsel %vm1022_vm7, %v3062_v24, 0.0  ;;  %vm1258_vm4 = vcmp.le.f32.partialorder %v3064_v25, -3.4028235e+38 }
 0x1e4   :  { %v1081_v27 = vsub.f32 %v2968_v60, %v3066_v26  ;;  %1138 = vadd.xlane.f32.xlu0 %v1137_v28  ;;  %v111_v28 = vld [vmem:[#allocation7 + $0x8] sm:$0xf]  ;;  %vm1257_vm5 = vcmp.le.f32.partialorder %v3066_v26, -3.4028235e+38 }
 0x1e5   :  { %v1109_v29 = vmul.f32 1.442695, %v1082_v36 }
 0x1e6   :  { %v1107_v30 = vmul.f32 1.442695, %v1081_v27 }
 0x1e7   :  { %2472 = vpow2.f32 %v1109_v29 }
 0x1e8   :  { %2474 = vpow2.f32 %v1107_v30 }
 0x1e9   :  { %v3077_v39 = vpop.eup %2468 }
 0x1ea   :  { %v3080_v59 = vpop.eup %2470  ;;  %v3082_v60 = vpop.xlane.xlu1 %1063  ;;  %v1146_v40 = vsel %vm1022_vm7, %v3077_v39, 0.0 }
 0x1eb   :  { %v3084_v53 = vpop.xlane.xlu0 %1060  ;;  %v1084_v43 = vsub.f32 %v2978_v18, %v3082_v60  ;;  %1147 = vadd.xlane.f32.xlu1 %v1146_v40  ;;  %v1143_v46 = vsel %vm1022_vm7, %v3080_v59, 0.0 }
 0x1ec   :  { %v1083_v45 = vsub.f32 %v2980_v19, %v3084_v53  ;;  %1144 = vadd.xlane.f32.xlu0 %v1143_v46 }
 0x1ed   :  { %v1113_v49 = vmul.f32 1.442695, %v1084_v43 }
 0x1ee   :  { %v1111_v13 = vmul.f32 1.442695, %v1083_v45  ;;  %v1424_v45 = vsel %vm1330_vm6, %v111_v28, 0 }
 0x1ef   :  { %2476 = vpow2.f32 %v1113_v49 }
 0x1f0   :  { %2478 = vpow2.f32 %v1111_v13 }
 0x1f1   :  { %v3096_v56 = vpop.eup %2472 }
 0x1f2   :  { %v3098_v18 = vpop.eup %2474  ;;  %v3100_v58 = vpop.xlane.xlu1 %1069  ;;  %v1152_v33 = vsel %vm1022_vm7, %v3096_v56, 0.0 }
 0x1f3   :  { %v3102_v19 = vpop.xlane.xlu0 %1066  ;;  %v1086_v61 = vsub.f32 %v2988_v37, %v3100_v58  ;;  %1153 = vadd.xlane.f32.xlu1 %v1152_v33  ;;  %v1149_v63 = vsel %vm1022_vm7, %v3098_v18, 0.0 }
 0x1f4   :  { %v1085_v34 = vsub.f32 %v2990_v38, %v3102_v19  ;;  %1150 = vadd.xlane.f32.xlu0 %v1149_v63  ;;  %v113_v63 = vld [vmem:[#allocation7 + $0x10] sm:$0xf] }
 0x1f5   :  { %v1117_v1 = vmul.f32 1.442695, %v1086_v61 }
 0x1f6   :  { %v1115_v52 = vmul.f32 1.442695, %v1085_v34 }
 0x1f7   :  { %2480 = vpow2.f32 %v1117_v1 }
 0x1f8   :  { %2482 = vpow2.f32 %v1115_v52 }
 0x1f9   :  { %v3112_v55 = vpop.eup %2476 }
 0x1fa   :  { %v3114_v5 = vpop.eup %2478  ;;  %v1158_v7 = vsel %vm1022_vm7, %v3112_v55, 0.0 }
 0x1fb   :  { %1159 = vadd.xlane.f32.xlu1 %v1158_v7  ;;  %v1155_v37 = vsel %vm1022_vm7, %v3114_v5, 0.0 }
 0x1fc   :  { %1156 = vadd.xlane.f32.xlu0 %v1155_v37 }
 0x201   :  { %v3120_v38 = vpop.eup %2480 }
 0x202   :  { %v3122_v8 = vpop.eup %2482  ;;  %v1164_v9 = vsel %vm1022_vm7, %v3120_v38, 0.0 }
 0x203   :  { %1165 = vadd.xlane.f32.xlu1 %v1164_v9  ;;  %v1161_v12 = vsel %vm1022_vm7, %v3122_v8, 0.0 }
 0x204   :  { %1162 = vadd.xlane.f32.xlu0 %v1161_v12 }
 0x258   :  { %v1121_v17 = vpop.xlane.xlu0 %1120 }
 0x259   :  { %2484 = vlog2.f32 %v1121_v17 }
 0x25a   :  { %2486 = vrcp.f32 %v1121_v17 }
 0x25c   :  { %v1124_v20 = vpop.xlane.xlu1 %1123 }
 0x25d   :  { %2488 = vlog2.f32 %v1124_v20 }
 0x25e   :  { %2490 = vrcp.f32 %v1124_v20  ;;  %v114_v20 = vld [vmem:[#allocation7 + $0x14] sm:$0xf] }
 0x25f   :  { %v1562_v28 = vsel %vm1330_vm6, %v114_v20, 0 }
 0x260   :  { %v1127_v21 = vpop.xlane.xlu0 %1126 }
 0x261   :  { %2492 = vlog2.f32 %v1127_v21 }
 0x262   :  { %2494 = vrcp.f32 %v1127_v21 }
 0x263   :  { %v2485_v22 = vpop.eup %2484 }
 0x264   :  { %v2487_v54 = vpop.eup %2486  ;;  %v1168_v35 = vmul.f32 0.6931472, %v2485_v22  ;;  %v1130_v36 = vpop.xlane.xlu1 %1129 }
 0x265   :  { %v1231_v27 = vmul.f32 %v2487_v54, %v3012_v51  ;;  %2496 = vlog2.f32 %v1130_v36  ;;  %v112_v51 = vld [vmem:[#allocation7 + $0xc] sm:$0xf] }
 0x266   :  { %v1199_v29 = vadd.f32 %v1168_v35, %v2996_v41  ;;  %2498 = vrcp.f32 %v1130_v36  ;;  %v1470_v34 = vsel %vm1330_vm6, %v112_v51, 0 }
 0x267   :  { %v2489_v30 = vpop.eup %2488  ;;  %v1295_v31 = vsel %vm1247_vm9, 0.0, %v1231_v27  ;;  %vm1260_vm9 = vcmp.le.f32.partialorder %v3082_v60, -3.4028235e+38 }
 0x268   :  { %v2491_v32 = vpop.eup %2490  ;;  %2098 = vst.msk [vmem:[#allocation11] sm:$0xff] %vm2097_vm8, %v1199_v29  ;;  %v1170_v40 = vmul.f32 0.6931472, %v2489_v30  ;;  %v1136_v42 = vpop.xlane.xlu1 %1135  ;;  %v1311_v43 = vpack.c.bf16 %v1295_v31, %v1295_v31 }
 0x269   :  { %v1232_v46 = vmul.f32 %v2491_v32, %v3024_v62  ;;  %2500 = vlog2.f32 %v1136_v42  ;;  %v1133_v41 = vpop.xlane.xlu0 %1132 }
 0x26a   :  { %v1200_v48 = vadd.f32 %v1170_v40, %v3000_v44  ;;  %2502 = vrcp.f32 %v1136_v42  ;;  %2344 = vmatmul.mubr.msk.bf16.vlgmr.msra.gmra.mrb[32].mxu0 %vm1022_vm7, %v1311_v43  ;;  %v115_v42 = vld [vmem:[#allocation7 + $0x18] sm:$0xf] }
 0x26b   :  { %v2493_v49 = vpop.eup %2492  ;;  %2504 = vlog2.f32 %v1133_v41  ;;  %v1296_v13 = vsel %vm1248_vm10, 0.0, %v1232_v46  ;;  %2354 = vmatpush3.bf16.msra.mxu0 %v1424_v45  ;;  %2355 = vmatprep.mubr.msk.bf16.mxu0 %vm2699_vm0, %v2698_v0  ;;  %vm1259_vm10 = vcmp.le.f32.partialorder %v3084_v53, -3.4028235e+38 }
 0x26c   :  { %v2495_v33 = vpop.eup %2494  ;;  %2099 = vst.msk [vmem:[#allocation11 + $0x8] sm:$0xff] %vm2097_vm8, %v1200_v48  ;;  %v1172_v62 = vmul.f32 0.6931472, %v2493_v49  ;;  %2506 = vrcp.f32 %v1133_v41  ;;  %v1312_v61 = vpack.c.bf16 %v1296_v13, %v1296_v13  ;;  %2365 = vmatprep.subr.bf16.mxu0 %v2698_v0 }
 0x26d   :  { %v1233_v44 = vmul.f32 %v2495_v33, %v3028_v2  ;;  %v1516_v2 = vsel %vm1330_vm6, %v113_v63, 0 }
 0x26e   :  { %v1201_v1 = vadd.f32 %v1172_v62, %v3004_v47  ;;  %2350 = vmatmul.mubr.msk.bf16.vlgmr.msra.gmra.mrb[32].mxu1 %vm1022_vm7, %v1312_v61 }
 0x26f   :  { %v2497_v52 = vpop.eup %2496  ;;  %2360 = vmatpush3.bf16.msra.mxu1 %v1470_v34  ;;  %v1297_v7 = vsel %vm1249_vm11, 0.0, %v1233_v44  ;;  %2361 = vmatprep.mubr.msk.bf16.mxu1 %vm2699_vm0, %v2698_v0  ;;  %vm1261_vm11 = vcmp.le.f32.partialorder %v3102_v19, -3.4028235e+38 }
 0x270   :  { %v2499_v37 = vpop.eup %2498  ;;  %2100 = vst.msk [vmem:[#allocation11 + $0x10] sm:$0xff] %vm2097_vm8, %v1201_v1  ;;  %v1174_v9 = vmul.f32 0.6931472, %v2497_v52  ;;  %v1142_v12 = vpop.xlane.xlu1 %1141  ;;  %v1313_v17 = vpack.c.bf16 %v1297_v7, %v1297_v7  ;;  %2371 = vmatprep.subr.bf16.mxu1 %v2698_v0  ;;  %v117_v52 = vld [vmem:[#allocation7 + $0x20] sm:$0xf] }
 0x271   :  { %v1234_v47 = vmul.f32 %v2499_v37, %v3040_v6  ;;  %2508 = vlog2.f32 %v1142_v12  ;;  %v1139_v22 = vpop.xlane.xlu0 %1138 }
 0x272   :  { %v1202_v21 = vadd.f32 %v1174_v9, %v3008_v50  ;;  %2510 = vrcp.f32 %v1142_v12  ;;  %2356 = vmatmul.mubr.msk.bf16.vlgmr.msra.gmra.mrb[36].mxu0 %vm1022_vm7, %v1313_v17 }
 0x273   :  { %v2501_v54 = vpop.eup %2500  ;;  %2512 = vlog2.f32 %v1139_v22  ;;  %v1298_v35 = vsel %vm1250_vm12, 0.0, %v1234_v47  ;;  %2366 = vmatpush3.bf16.msra.mxu0 %v1516_v2  ;;  %2367 = vmatprep.mubr.msk.bf16.mxu0 %vm2699_vm0, %v2698_v0 }
 0x274   :  { %v2503_v36 = vpop.eup %2502  ;;  %2101 = vst.msk [vmem:[#allocation11 + $0x18] sm:$0xff] %vm2097_vm8, %v1202_v21  ;;  %v1178_v6 = vmul.f32 0.6931472, %v2501_v54  ;;  %2514 = vrcp.f32 %v1139_v22  ;;  %v1314_v27 = vpack.c.bf16 %v1298_v35, %v1298_v35  ;;  %2377 = vmatprep.subr.bf16.mxu0 %v2698_v0 }
 0x275   :  { %v2505_v50 = vpop.eup %2504  ;;  %v1236_v29 = vmul.f32 %v2503_v36, %v3044_v10 }
 0x276   :  { %v2507_v30 = vpop.eup %2506  ;;  %v1204_v31 = vadd.f32 %v1178_v6, %v3014_v57  ;;  %v1176_v32 = vmul.f32 0.6931472, %v2505_v50  ;;  %2362 = vmatmul.mubr.msk.bf16.vlgmr.msra.gmra.mrb[36].mxu1 %vm1022_vm7, %v1314_v27  ;;  %v1608_v57 = vsel %vm1330_vm6, %v115_v42, 0 }
 0x277   :  { %v1235_v40 = vmul.f32 %v2507_v30, %v3046_v15  ;;  %2372 = vmatpush3.bf16.msra.mxu1 %v1562_v28  ;;  %2373 = vmatprep.mubr.msk.bf16.mxu1 %vm2699_vm0, %v2698_v0  ;;  %v1300_v46 = vsel %vm1252_vm13, 0.0, %v1236_v29  ;;  %v116_v15 = vld [vmem:[#allocation7 + $0x1c] sm:$0xf]  ;;  %v119_v28 = vld [vmem:[#allocation7 + $0x28] sm:$0xf] }
 0x278   :  { %2103 = vst.msk [vmem:[#allocation11 + $0x28] sm:$0xff] %vm2097_vm8, %v1204_v31  ;;  %v1203_v10 = vadd.f32 %v1176_v32, %v3016_v14  ;;  %v1148_v43 = vpop.xlane.xlu1 %1147  ;;  %2383 = vmatprep.subr.bf16.mxu1 %v2698_v0  ;;  %v1316_v14 = vpack.c.bf16 %v1300_v46, %v1300_v46  ;;  %v1654_v33 = vsel %vm1330_vm6, %v116_v15, 0  ;;  %v120_v31 = vld [vmem:[#allocation7 + $0x2c] sm:$0xf] }
 0x279   :  { %2516 = vlog2.f32 %v1148_v43  ;;  %v1299_v45 = vsel %vm1251_vm14, 0.0, %v1235_v40  ;;  %v1145_v51 = vpop.xlane.xlu0 %1144 }
 0x27a   :  { %2102 = vst.msk [vmem:[#allocation11 + $0x20] sm:$0xff] %vm2097_vm8, %v1203_v10  ;;  %2518 = vrcp.f32 %v1148_v43  ;;  %v1315_v48 = vpack.c.bf16 %v1299_v45, %v1299_v45  ;;  %v1838_v43 = vsel %vm1330_vm6, %v120_v31, 0 }
 0x27b   :  { %v2509_v41 = vpop.eup %2508  ;;  %2520 = vlog2.f32 %v1145_v51 }
 0x27c   :  { %v2511_v49 = vpop.eup %2510  ;;  %v1182_v13 = vmul.f32 0.6931472, %v2509_v41  ;;  %2522 = vrcp.f32 %v1145_v51  ;;  %2368 = vmatmul.mubr.msk.bf16.vlgmr.msra.gmra.mrb[40].mxu0 %vm1022_vm7, %v1315_v48  ;;  %v121_v41 = vld [vmem:[#allocation7 + $0x30] sm:$0xf] }
 0x27d   :  { %v2513_v62 = vpop.eup %2512  ;;  %v1238_v61 = vmul.f32 %v2511_v49, %v3060_v23  ;;  %2378 = vmatpush3.bf16.msra.mxu0 %v1608_v57  ;;  %2379 = vmatprep.mubr.msk.bf16.mxu0 %vm2699_vm0, %v2698_v0 }
 0x27e   :  { %v2515_v34 = vpop.eup %2514  ;;  %v1206_v44 = vadd.f32 %v1182_v13, %v3030_v3  ;;  %v1180_v63 = vmul.f32 0.6931472, %v2513_v62  ;;  %2374 = vmatmul.mubr.msk.bf16.vlgmr.msra.gmra.mrb[40].mxu1 %vm1022_vm7, %v1316_v14  ;;  %2389 = vmatprep.subr.bf16.mxu0 %v2698_v0  ;;  %v1700_v3 = vsel %vm1330_vm6, %v117_v52, 0 }
 0x27f   :  { %v1237_v1 = vmul.f32 %v2515_v34, %v3062_v24  ;;  %2384 = vmatpush3.bf16.msra.mxu1 %v1654_v33  ;;  %2385 = vmatprep.mubr.msk.bf16.mxu1 %vm2699_vm0, %v2698_v0  ;;  %v1302_v9 = vsel %vm1254_vm15, 0.0, %v1238_v61  ;;  %v118_v24 = vld [vmem:[#allocation7 + $0x24] sm:$0xf]  ;;  %v122_v33 = vld [vmem:[#allocation7 + $0x34] sm:$0xf] }
 0x280   :  { %2105 = vst.msk [vmem:[#allocation11 + $0x38] sm:$0xff] %vm2097_vm8, %v1206_v44  ;;  %v1205_v23 = vadd.f32 %v1180_v63, %v3032_v4  ;;  %v1154_v7 = vpop.xlane.xlu1 %1153  ;;  %2395 = vmatprep.subr.bf16.mxu1 %v2698_v0  ;;  %v1318_v4 = vpack.c.bf16 %v1302_v9, %v1302_v9  ;;  %v1746_v21 = vsel %vm1330_vm6, %v118_v24, 0  ;;  %v1930_v63 = vsel %vm1330_vm6, %v122_v33, 0  ;;  %v123_v24 = vld [vmem:[#allocation7 + $0x38] sm:$0xf] }
 0x281   :  { %2524 = vlog2.f32 %v1154_v7  ;;  %v1301_v37 = vsel %vm1253_vm1, 0.0, %v1237_v1  ;;  %v1151_v12 = vpop.xlane.xlu0 %1150 }
 0x282   :  { %2104 = vst.msk [vmem:[#allocation11 + $0x30] sm:$0xff] %vm2097_vm8, %v1205_v23  ;;  %2526 = vrcp.f32 %v1154_v7  ;;  %v1317_v17 = vpack.c.bf16 %v1301_v37, %v1301_v37 }
 0x283   :  { %v2517_v2 = vpop.eup %2516  ;;  %2528 = vlog2.f32 %v1151_v12 }
 0x284   :  { %v2519_v47 = vpop.eup %2518  ;;  %v1186_v20 = vmul.f32 0.6931472, %v2517_v2  ;;  %2530 = vrcp.f32 %v1151_v12  ;;  %2380 = vmatmul.mubr.msk.bf16.vlgmr.msra.gmra.mrb[44].mxu0 %vm1022_vm7, %v1317_v17  ;;  %v1976_v2 = vsel %vm1330_vm6, %v123_v24, 0 }
 0x285   :  { %v2521_v22 = vpop.eup %2520  ;;  %v1240_v54 = vmul.f32 %v2519_v47, %v3077_v39  ;;  %2390 = vmatpush3.bf16.msra.mxu0 %v1700_v3  ;;  %2391 = vmatprep.mubr.msk.bf16.mxu0 %vm2699_vm0, %v2698_v0  ;;  %v124_v3 = vld [vmem:[#allocation7 + $0x3c] sm:$0xf] }
 0x286   :  { %v2523_v35 = vpop.eup %2522  ;;  %v1208_v36 = vadd.f32 %v1186_v20, %v3048_v16  ;;  %v1184_v6 = vmul.f32 0.6931472, %v2521_v22  ;;  %2386 = vmatmul.mubr.msk.bf16.vlgmr.msra.gmra.mrb[44].mxu1 %vm1022_vm7, %v1318_v4  ;;  %2401 = vmatprep.subr.bf16.mxu0 %v2698_v0  ;;  %v1792_v16 = vsel %vm1330_vm6, %v119_v28, 0 }
 0x287   :  { %v1239_v27 = vmul.f32 %v2523_v35, %v3080_v59  ;;  %2396 = vmatpush3.bf16.msra.mxu1 %v1746_v21  ;;  %2397 = vmatprep.mubr.msk.bf16.mxu1 %vm2699_vm0, %v2698_v0  ;;  %v1304_v59 = vsel %vm1256_vm2, 0.0, %v1240_v54  ;;  %v2022_v21 = vsel %vm1330_vm6, %v124_v3, 0 }
 0x288   :  { %2107 = vst.msk [vmem:[#allocation11 + $0x48] sm:$0xff] %vm2097_vm8, %v1208_v36  ;;  %v1207_v39 = vadd.f32 %v1184_v6, %v3050_v11  ;;  %v1160_v50 = vpop.xlane.xlu1 %1159  ;;  %2407 = vmatprep.subr.bf16.mxu1 %v2698_v0  ;;  %v1320_v11 = vpack.c.bf16 %v1304_v59, %v1304_v59 }
 0x289   :  { %2532 = vlog2.f32 %v1160_v50  ;;  %v1157_v29 = vpop.xlane.xlu0 %1156  ;;  %v1303_v30 = vsel %vm1255_vm3, 0.0, %v1239_v27 }
 0x28a   :  { %2106 = vst.msk [vmem:[#allocation11 + $0x40] sm:$0xff] %vm2097_vm8, %v1207_v39  ;;  %2534 = vrcp.f32 %v1160_v50  ;;  %v1319_v32 = vpack.c.bf16 %v1303_v30, %v1303_v30 }
 0x28b   :  { %v2525_v40 = vpop.eup %2524  ;;  %2536 = vlog2.f32 %v1157_v29 }
 0x28c   :  { %v2527_v42 = vpop.eup %2526  ;;  %v1190_v10 = vmul.f32 0.6931472, %v2525_v40  ;;  %2538 = vrcp.f32 %v1157_v29  ;;  %2392 = vmatmul.mubr.msk.bf16.vlgmr.msra.gmra.mrb[48].mxu0 %vm1022_vm7, %v1319_v32 }
 0x28d   :  { %v2529_v45 = vpop.eup %2528  ;;  %v1242_v46 = vmul.f32 %v2527_v42, %v3096_v56  ;;  %2402 = vmatpush3.bf16.msra.mxu0 %v1792_v16  ;;  %2403 = vmatprep.mubr.msk.bf16.mxu0 %vm2699_vm0, %v2698_v0 }
 0x28e   :  { %v2531_v15 = vpop.eup %2530  ;;  %v1210_v51 = vadd.f32 %v1190_v10, %v3064_v25  ;;  %v1188_v48 = vmul.f32 0.6931472, %v2529_v45  ;;  %2398 = vmatmul.mubr.msk.bf16.vlgmr.msra.gmra.mrb[48].mxu1 %vm1022_vm7, %v1320_v11  ;;  %2413 = vmatprep.subr.bf16.mxu0 %v2698_v0  ;;  %v1884_v25 = vsel %vm1330_vm6, %v121_v41, 0  ;;  %vm1262_vm6 = vcmp.le.f32.partialorder %v3100_v58, -3.4028235e+38 }
 0x28f   :  { %v1241_v57 = vmul.f32 %v2531_v15, %v3098_v18  ;;  %2408 = vmatpush3.bf16.msra.mxu1 %v1838_v43  ;;  %2409 = vmatprep.mubr.msk.bf16.mxu1 %vm2699_vm0, %v2698_v0  ;;  %v1306_v18 = vsel %vm1258_vm4, 0.0, %v1242_v46 }
 0x290   :  { %2109 = vst.msk [vmem:[#allocation11 + $0x58] sm:$0xff] %vm2097_vm8, %v1210_v51  ;;  %v1209_v56 = vadd.f32 %v1188_v48, %v3066_v26  ;;  %v1166_v49 = vpop.xlane.xlu1 %1165  ;;  %2419 = vmatprep.subr.bf16.mxu1 %v2698_v0  ;;  %v1322_v26 = vpack.c.bf16 %v1306_v18, %v1306_v18 }
 0x291   :  { %2540 = vlog2.f32 %v1166_v49  ;;  %v1163_v13 = vpop.xlane.xlu0 %1162  ;;  %v1305_v14 = vsel %vm1257_vm5, 0.0, %v1241_v57 }
 0x292   :  { %2108 = vst.msk [vmem:[#allocation11 + $0x50] sm:$0xff] %vm2097_vm8, %v1209_v56  ;;  %2542 = vrcp.f32 %v1166_v49  ;;  %v1321_v62 = vpack.c.bf16 %v1305_v14, %v1305_v14 }
 0x293   :  { %v2533_v61 = vpop.eup %2532  ;;  %2544 = vlog2.f32 %v1163_v13 }
 0x294   :  { %v2535_v34 = vpop.eup %2534  ;;  %v1194_v44 = vmul.f32 0.6931472, %v2533_v61  ;;  %2546 = vrcp.f32 %v1163_v13  ;;  %2404 = vmatmul.mubr.msk.bf16.vlgmr.msra.gmra.mrb[52].mxu0 %vm1022_vm7, %v1321_v62 }
 0x295   :  { %v2537_v1 = vpop.eup %2536  ;;  %v1244_v52 = vmul.f32 %v2535_v34, %v3112_v55  ;;  %2414 = vmatpush3.bf16.msra.mxu0 %v1884_v25  ;;  %2415 = vmatprep.mubr.msk.bf16.mxu0 %vm2699_vm0, %v2698_v0 }
 0x296   :  { %v2539_v23 = vpop.eup %2538  ;;  %v1212_v7 = vadd.f32 %v1194_v44, %v3082_v60  ;;  %v1192_v37 = vmul.f32 0.6931472, %v2537_v1  ;;  %2410 = vmatmul.mubr.msk.bf16.vlgmr.msra.gmra.mrb[52].mxu1 %vm1022_vm7, %v1322_v26  ;;  %2425 = vmatprep.subr.bf16.mxu0 %v2698_v0 }
 0x297   :  { %v1243_v9 = vmul.f32 %v2539_v23, %v3114_v5  ;;  %2420 = vmatpush3.bf16.msra.mxu1 %v1930_v63  ;;  %2421 = vmatprep.mubr.msk.bf16.mxu1 %vm2699_vm0, %v2698_v0  ;;  %v1308_v17 = vsel %vm1260_vm9, 0.0, %v1244_v52 }
 0x298   :  { %2111 = vst.msk [vmem:[#allocation11 + $0x68] sm:$0xff] %vm2097_vm8, %v1212_v7  ;;  %v1211_v55 = vadd.f32 %v1192_v37, %v3084_v53  ;;  %2431 = vmatprep.subr.bf16.mxu1 %v2698_v0  ;;  %v1324_v60 = vpack.c.bf16 %v1308_v17, %v1308_v17 }
 0x299   :  { %v1307_v12 = vsel %vm1259_vm10, 0.0, %v1243_v9 }
 0x29a   :  { %2110 = vst.msk [vmem:[#allocation11 + $0x60] sm:$0xff] %vm2097_vm8, %v1211_v55  ;;  %v1323_v5 = vpack.c.bf16 %v1307_v12, %v1307_v12 }
 0x29b   :  { %v2541_v47 = vpop.eup %2540 }
 0x29c   :  { %v2543_v20 = vpop.eup %2542  ;;  %v1198_v4 = vmul.f32 0.6931472, %v2541_v47  ;;  %2416 = vmatmul.mubr.msk.bf16.vlgmr.msra.gmra.mrb[56].mxu0 %vm1022_vm7, %v1323_v5 }
 0x29d   :  { %v2545_v22 = vpop.eup %2544  ;;  %v1246_v53 = vmul.f32 %v2543_v20, %v3120_v38  ;;  %2426 = vmatpush3.bf16.msra.mxu0 %v1976_v2  ;;  %2427 = vmatprep.mubr.msk.bf16.mxu0 %vm2699_vm0, %v2698_v0 }
 0x29e   :  { %v2547_v54 = vpop.eup %2546  ;;  %v1214_v35 = vadd.f32 %v1198_v4, %v3100_v58  ;;  %v1196_v36 = vmul.f32 0.6931472, %v2545_v22  ;;  %2422 = vmatmul.mubr.msk.bf16.vlgmr.msra.gmra.mrb[56].mxu1 %vm1022_vm7, %v1324_v60 }
 0x29f   :  { %v1245_v6 = vmul.f32 %v2547_v54, %v3122_v8  ;;  %2432 = vmatpush3.bf16.msra.mxu1 %v2022_v21  ;;  %2433 = vmatprep.mubr.msk.bf16.mxu1 %vm2699_vm0, %v2698_v0  ;;  %v1310_v28 = vsel %vm1262_vm6, 0.0, %v1246_v53 }
 0x2a0   :  { %2113 = vst.msk [vmem:[#allocation11 + $0x78] sm:$0xff] %vm2097_vm8, %v1214_v35  ;;  %v1213_v38 = vadd.f32 %v1196_v36, %v3102_v19  ;;  %v1326_v8 = vpack.c.bf16 %v1310_v28, %v1310_v28 }
 0x2a1   :  { %v1309_v27 = vsel %vm1261_vm11, 0.0, %v1245_v6 }
 0x2a2   :  { %2112 = vst.msk [vmem:[#allocation11 + $0x70] sm:$0xff] %vm2097_vm8, %v1213_v38  ;;  %v1325_v39 = vpack.c.bf16 %v1309_v27, %v1309_v27 }
 0x2a4   :  { %2428 = vmatmul.mubr.msk.bf16.vlgmr.msra.gmra.mrb[60].mxu0 %vm1022_vm7, %v1325_v39 }
 0x2a6   :  { %2434 = vmatmul.mubr.msk.bf16.vlgmr.msra.gmra.mrb[60].mxu1 %vm1022_vm7, %v1326_v8 }
 0x2a7   :  { %2647 = shalt.err (!%p2644_p8)
}
 0x2a8   :  { %s2648_s23 = scalar_lea.hbm %s3310_s5, 2048 }
 0x2a9   :  { %p2649_p9 = scmp.ne.s32.totalorder %s3310_s5, %s2648_s23  ;;  %p2652_p10 = scmp.lt.u32.totalorder %s2648_s23, %s3310_s5 }
 0x2ab   :  { %p2654_p11 = pnand %p2652_p10, %p2649_p9 }
 0x2ad   :  { %2657 = shalt.err (!%p2654_p11)
}
 0x2ae   :  { %s2702_s28 = smov 128   ;;  %s2703_s29 = smov 8   ;;  %vm2080_vm0 = vcmask 257024  }
 0x2af   :  { %2137 = dma.vmem_to_hbm [thread:$0]  %s2132_s18, 2048, %s3310_s5, [#allocation12], %s2702_s28, %s2702_s28, %s2703_s29  }
 0x2b0   :  { %s2704_s5 = smov [#allocation10]  }
 0x2b1   :  { %s2119_s7 = sshll.u32 %s2704_s5, 4  ;;  %s2120_s7 = int_to_ptr.vmem [resolvable:$true] %s2119_s7 }
 0x2b2   :  { %s2658_s8 = scalar_lea.vmem %s2120_s7, 1024  ;;  %p2663_p13 = scmp.lt.s32.totalorder %s2120_s7, %s2120_s7 }
 0x2b3   :  { %p2659_p12 = scmp.ne.s32.totalorder %s2120_s7, %s2658_s8  ;;  %p2664_p0 = scmp.lt.s32.totalorder %s2658_s8, %s2658_s8 }
 0x2b5   :  { %p2665_p1 = por %p2664_p0, %p2663_p13 }
 0x2b7   :  { %p2666_p2 = pnand %p2665_p1, %p2659_p12 }
 0x33d   :  { %v1368_v0 = vpop.f32.mrb[32].mxu0 }
 0x33e   :  { %v2064_v58 = vpack.c.bf16 %v1368_v0, %v1368_v0  ;;  %v2345_v19 = vpop.f32.mrb[33].mxu0 }
 0x33f   :  { %v1371_v50 = vpop.f32.mrb[34].mxu0 }
 0x340   :  { %2081 = vst.msk [vmem:[#allocation10] sm:$0xf] %vm2080_vm0, %v2064_v58  ;;  %v2346_v29 = vpop.f32.mrb[35].mxu0 }
 0x341   :  { %v1414_v30 = vpop.f32.mrb[32].mxu1 }
 0x342   :  { %v2065_v59 = vpack.c.bf16 %v1414_v30, %v1414_v30  ;;  %v2351_v31 = vpop.f32.mrb[33].mxu1 }
 0x343   :  { %v1417_v32 = vpop.f32.mrb[34].mxu1 }
 0x344   :  { %2082 = vst.msk [vmem:[#allocation10 + $0x4] sm:$0xf] %vm2080_vm0, %v2065_v59  ;;  %v2352_v16 = vpop.f32.mrb[35].mxu1 }
 0x345   :  { %v1460_v40 = vpop.f32.mrb[36].mxu0 }
 0x346   :  { %v2066_v42 = vpack.c.bf16 %v1460_v40, %v1460_v40  ;;  %v2357_v10 = vpop.f32.mrb[37].mxu0 }
 0x347   :  { %v1463_v11 = vpop.f32.mrb[38].mxu0 }
 0x348   :  { %2083 = vst.msk [vmem:[#allocation10 + $0x8] sm:$0xf] %vm2080_vm0, %v2066_v42  ;;  %v2358_v43 = vpop.f32.mrb[39].mxu0 }
 0x349   :  { %v1506_v45 = vpop.f32.mrb[36].mxu1 }
 0x34a   :  { %v2067_v46 = vpack.c.bf16 %v1506_v45, %v1506_v45  ;;  %v2363_v15 = vpop.f32.mrb[37].mxu1 }
 0x34b   :  { %v1509_v51 = vpop.f32.mrb[38].mxu1 }
 0x34c   :  { %2084 = vst.msk [vmem:[#allocation10 + $0xc] sm:$0xf] %vm2080_vm0, %v2067_v46  ;;  %v2364_v48 = vpop.f32.mrb[39].mxu1 }
 0x34f   :  { %v1552_v57 = vpop.f32.mrb[40].mxu0 }
 0x350   :  { %v2068_v41 = vpack.c.bf16 %v1552_v57, %v1552_v57  ;;  %v2369_v56 = vpop.f32.mrb[41].mxu0 }
 0x351   :  { %v1555_v49 = vpop.f32.mrb[42].mxu0  ;;  %v1598_v13 = vpop.f32.mrb[40].mxu1 }
 0x352   :  { %2085 = vst.msk [vmem:[#allocation10 + $0x10] sm:$0xf] %vm2080_vm0, %v2068_v41  ;;  %v2370_v14 = vpop.f32.mrb[43].mxu0  ;;  %v2069_v18 = vpack.c.bf16 %v1598_v13, %v1598_v13  ;;  %v2375_v33 = vpop.f32.mrb[41].mxu1 }
 0x353   :  { %v1601_v62 = vpop.f32.mrb[42].mxu1 }
 0x354   :  { %2086 = vst.msk [vmem:[#allocation10 + $0x14] sm:$0xf] %vm2080_vm0, %v2069_v18  ;;  %v2376_v25 = vpop.f32.mrb[43].mxu1 }
 0x357   :  { %v1644_v61 = vpop.f32.mrb[44].mxu0 }
 0x358   :  { %v2070_v34 = vpack.c.bf16 %v1644_v61, %v1644_v61  ;;  %v2381_v44 = vpop.f32.mrb[45].mxu0 }
 0x359   :  { %v1647_v26 = vpop.f32.mrb[46].mxu0  ;;  %v1690_v63 = vpop.f32.mrb[44].mxu1 }
 0x35a   :  { %2087 = vst.msk [vmem:[#allocation10 + $0x18] sm:$0xf] %vm2080_vm0, %v2070_v34  ;;  %v2382_v1 = vpop.f32.mrb[47].mxu0  ;;  %v2071_v52 = vpack.c.bf16 %v1690_v63, %v1690_v63  ;;  %v2387_v23 = vpop.f32.mrb[45].mxu1 }
 0x35b   :  { %v1693_v7 = vpop.f32.mrb[46].mxu1 }
 0x35c   :  { %2088 = vst.msk [vmem:[#allocation10 + $0x1c] sm:$0xf] %vm2080_vm0, %v2071_v52  ;;  %v2388_v37 = vpop.f32.mrb[47].mxu1 }
 0x35f   :  { %v1736_v9 = vpop.f32.mrb[48].mxu0 }
 0x360   :  { %v2072_v24 = vpack.c.bf16 %v1736_v9, %v1736_v9  ;;  %v2393_v55 = vpop.f32.mrb[49].mxu0 }
 0x361   :  { %v1739_v12 = vpop.f32.mrb[50].mxu0  ;;  %v1782_v17 = vpop.f32.mrb[48].mxu1 }
 0x362   :  { %2089 = vst.msk [vmem:[#allocation10 + $0x20] sm:$0xf] %vm2080_vm0, %v2072_v24  ;;  %v2394_v3 = vpop.f32.mrb[51].mxu0  ;;  %v2073_v5 = vpack.c.bf16 %v1782_v17, %v1782_v17  ;;  %v2399_v2 = vpop.f32.mrb[49].mxu1 }
 0x363   :  { %v1785_v47 = vpop.f32.mrb[50].mxu1 }
 0x364   :  { %2090 = vst.msk [vmem:[#allocation10 + $0x24] sm:$0xf] %vm2080_vm0, %v2073_v5  ;;  %v2400_v20 = vpop.f32.mrb[51].mxu1 }
 0x367   :  { %v1828_v4 = vpop.f32.mrb[52].mxu0 }
 0x368   :  { %v2074_v60 = vpack.c.bf16 %v1828_v4, %v1828_v4  ;;  %v2405_v21 = vpop.f32.mrb[53].mxu0 }
 0x369   :  { %v1831_v22 = vpop.f32.mrb[54].mxu0  ;;  %v1874_v53 = vpop.f32.mrb[52].mxu1 }
 0x36a   :  { %2091 = vst.msk [vmem:[#allocation10 + $0x28] sm:$0xf] %vm2080_vm0, %v2074_v60  ;;  %v2406_v54 = vpop.f32.mrb[55].mxu0  ;;  %v2075_v35 = vpack.c.bf16 %v1874_v53, %v1874_v53  ;;  %v2411_v36 = vpop.f32.mrb[53].mxu1 }
 0x36b   :  { %v1877_v6 = vpop.f32.mrb[54].mxu1 }
 0x36c   :  { %2092 = vst.msk [vmem:[#allocation10 + $0x2c] sm:$0xf] %vm2080_vm0, %v2075_v35  ;;  %v2412_v38 = vpop.f32.mrb[55].mxu1 }
 0x36f   :  { %v1920_v27 = vpop.f32.mrb[56].mxu0 }
 0x370   :  { %v2076_v28 = vpack.c.bf16 %v1920_v27, %v1920_v27  ;;  %v2417_v39 = vpop.f32.mrb[57].mxu0 }
 0x371   :  { %v1923_v8 = vpop.f32.mrb[58].mxu0  ;;  %v1966_v0 = vpop.f32.mrb[56].mxu1 }
 0x372   :  { %2093 = vst.msk [vmem:[#allocation10 + $0x30] sm:$0xf] %vm2080_vm0, %v2076_v28  ;;  %v2418_v58 = vpop.f32.mrb[59].mxu0  ;;  %v2077_v19 = vpack.c.bf16 %v1966_v0, %v1966_v0  ;;  %v2423_v50 = vpop.f32.mrb[57].mxu1 }
 0x373   :  { %v1969_v29 = vpop.f32.mrb[58].mxu1 }
 0x374   :  { %2094 = vst.msk [vmem:[#allocation10 + $0x34] sm:$0xf] %vm2080_vm0, %v2077_v19  ;;  %v2424_v30 = vpop.f32.mrb[59].mxu1 }
 0x377   :  { %v2012_v59 = vpop.f32.mrb[60].mxu0 }
 0x378   :  { %v2078_v31 = vpack.c.bf16 %v2012_v59, %v2012_v59  ;;  %v2429_v32 = vpop.f32.mrb[61].mxu0 }
 0x379   :  { %v2015_v16 = vpop.f32.mrb[62].mxu0  ;;  %v2058_v40 = vpop.f32.mrb[60].mxu1 }
 0x37a   :  { %2095 = vst.msk [vmem:[#allocation10 + $0x38] sm:$0xf] %vm2080_vm0, %v2078_v31  ;;  %v2430_v42 = vpop.f32.mrb[63].mxu0  ;;  %v2079_v10 = vpack.c.bf16 %v2058_v40, %v2058_v40  ;;  %v2435_v11 = vpop.f32.mrb[61].mxu1 }
 0x37b   :  { %v2061_v43 = vpop.f32.mrb[62].mxu1 }
 0x37c   :  { %2096 = vst.msk [vmem:[#allocation10 + $0x3c] sm:$0xf] %vm2080_vm0, %v2079_v10  ;;  %v2436_v45 = vpop.f32.mrb[63].mxu1 }
 0x37d   :  { %2669 = shalt.err (!%p2666_p2)
}
 0x37e   :  { %s2670_s11 = scalar_lea.hbm %s3309_s4, 1024 }
 0x37f   :  { %p2671_p3 = scmp.ne.s32.totalorder %s3309_s4, %s2670_s11  ;;  %p2674_p4 = scmp.lt.u32.totalorder %s2670_s11, %s3309_s4 }
 0x381   :  { %p2676_p5 = pnand %p2674_p4, %p2671_p3 }
 0x383   :  { %2679 = shalt.err (!%p2676_p5)
}
 0x384   :  { %2125 = dma.vmem_to_hbm [thread:$0]  %s2120_s7, 1024, %s3309_s4, [#allocation4], %s2692_s30, %s2692_s30, %s2693_s6  }
 0x385   :  { %2686 = dma.done.wait [#allocation4], 1024  }
 0x386   :  { %2687 = vsyncadd [#allocation4], 4294966272 }
 0x387   :  { %2688 = dma.done.wait [#allocation12], 2048  }
 0x388   :  { %2689 = vsyncadd [#allocation12], 4294965248 }
 0x389   :  { %2144 = vsyncpa [#allocation3], 1 }
 0x38a   :  { %2145 = vsyncpa [#allocation6], 1 }
 0x38b   :  { %2146 = vsyncpa [#allocation9], 1 }
 0x38c   :  { %2147 = vsyncpa [#allocation4], 1 }
 0x38d   :  { %2148 = vsyncpa [#allocation12], 1 }

</bundles_post_ra>
